<compile_context>
chip_gen: v5e
topology: v5e:2x2
jax: 0.10.0
libtpu: 0.0.40
codegen_flags: <defaults>
</compile_context>

<pallas_src>
import numpy as np
import jax
import jax.numpy as jnp
from jax.experimental import pallas as pl
from jax.experimental.pallas import tpu as pltpu


# ----------------------------------------------------------------------------
# One-time probe: does pltpu.roll lower here and match jnp.roll semantics?
# ----------------------------------------------------------------------------
_ROLL_OK = None


def _roll_supported():
    global _ROLL_OK
    if _ROLL_OK is not None:
        return _ROLL_OK
    try:
        def probe(x_ref, a_ref, b_ref):
            a_ref[...] = pltpu.roll(x_ref[...], 1, 0)
            b_ref[...] = pltpu.roll(x_ref[...], -1, 0)

        x = jnp.arange(256 * 64, dtype=jnp.float32).reshape(256, 64)
        a, b = pl.pallas_call(
            probe,
            out_shape=(jax.ShapeDtypeStruct((256, 64), jnp.float32),
                       jax.ShapeDtypeStruct((256, 64), jnp.float32)),
        )(x)
        _ROLL_OK = bool(
            np.allclose(np.asarray(a), np.asarray(jnp.roll(x, 1, axis=0))) and
            np.allclose(np.asarray(b), np.asarray(jnp.roll(x, -1, axis=0))))
    except Exception:
        _ROLL_OK = False
    return _ROLL_OK


# ----------------------------------------------------------------------------
# Generation-aware tiling
# ----------------------------------------------------------------------------
def _tpu_config(use_bf16):
    vmem_cap = None
    try:
        get_info = getattr(pltpu, "get_tpu_info", None)
        if get_info is not None:
            vmem_cap = getattr(get_info(), "vmem_capacity_bytes", None)
    except Exception:
        vmem_cap = None
    if vmem_cap is not None and vmem_cap >= 100 * 1024 * 1024:
        # v5e / v6e: 128 MiB VMEM, one TensorCore -> single fat tile.
        return dict(cap=512, vmem_limit=64 * 1024 * 1024, n_cores=1)
    # v7x-like (64 MiB VMEM, 2 TCs) or unknown: stay conservative.
    return dict(cap=512 if use_bf16 else 256,
                vmem_limit=48 * 1024 * 1024, n_cores=2)


def _choose_batch_tile(B, cap, n_cores):
    if B <= cap:
        if n_cores > 1 and B >= 16 and B % 16 == 0:
            return B // 2            # two grid steps -> both TensorCores busy
        return B                     # one full block (always a legal block)
    steps = pl.cdiv(B, cap)
    if n_cores > 1 and steps % 2 == 1:
        steps += 1                   # even step count on the 2-TC chip
    tb = -(-B // steps)              # ceil
    return -(-tb // 8) * 8           # sublane-aligned


def _bcast_spec(arr):
    zeros = (0,) * arr.ndim
    return pl.BlockSpec(arr.shape, lambda b, _z=zeros: _z)


# ----------------------------------------------------------------------------
# One-time weight packing (outside the hot path)
# ----------------------------------------------------------------------------
def prepare_weights(p, *, use_bf16=False):
    mm_dtype = jnp.bfloat16 if use_bf16 else jnp.float32

    w1, w2, w3 = p['w1'], p['w2'], p['w3']              # (3, Cin, Cout)
    wa, wc, wf1 = p['wa'], p['wc'], p['wf1']
    A = wa.shape[0]
    # Hard-coded concat order [conv(128) | asset(32) | account(32)] -> assert loudly.
    assert w3.shape[2] == 128 and wa.shape[1] == 32 and wc.shape[1] == 32
    assert wf1.shape[0] == 128 + 32 + 32

    # Block-diagonal joint asset/account encoder for aux = [asset | account].
    w_aux = jnp.zeros((A + 3, 64), jnp.float32)
    w_aux = w_aux.at[:A, :32].set(wa).at[A:, 32:].set(wc)
    b_aux = jnp.concatenate([p['ba'], p['bc']], axis=1)                  # (1, 64)

    # fc1 split matching the implicit concat [x1 | x2x3].
    wf1m, wf1ac = wf1[:128], wf1[128:]

    # Lane-dense head: pad logits to a multiple of 128 (zero cols, -1e30 bias).
    wo, bo = p['wo'], p['bo']
    n_actions = wo.shape[1]
    n_pad = max(128, -(-n_actions // 128) * 128)
    wo_pad = jnp.zeros((wo.shape[0], n_pad), jnp.float32).at[:, :n_actions].set(wo)
    bo_pad = jnp.full((1, n_pad), -1e30, jnp.float32).at[:, :n_actions].set(bo)

    # Pack all biases into one lane-aligned (1, NB) f32 array.
    biases = [p['b1'], p['b2'], p['b3'], b_aux, p['bf1'], p['bf2'], p['bf3'], bo_pad]
    slots, off = [], 0
    for b in biases:
        width = b.shape[1]
        slots.append((off, width))
        off += -(-width // 128) * 128          # every slot starts 128-aligned
    b_pack = jnp.zeros((1, off), jnp.float32)
    for b, (o, width) in zip(biases, slots):
        b_pack = b_pack.at[:, o:o + width].set(b)

    cast = lambda a: a.astype(mm_dtype)
    arrays = (cast(w1), cast(w2), cast(w3), cast(w_aux),
              cast(wf1m), cast(wf1ac), cast(p['wf2']), cast(p['wf3']),
              cast(wo_pad), b_pack)
    return dict(arrays=arrays, bias_slots=tuple(slots),
                n_actions=n_actions, n_pad=n_pad, mm_dtype=mm_dtype)


# ----------------------------------------------------------------------------
# Forward pass
# ----------------------------------------------------------------------------
def actor_forward(market, asset_id, account_state, weights, *, batch_tile=None):
    B, W, F = market.shape
    A = asset_id.shape[1]
    arrays = weights['arrays']
    (w1, w2, w3, w_aux, wf1m, wf1ac, wf2, wf3, wo_pad, b_pack) = arrays
    slots = weights['bias_slots']
    n_actions, n_pad = weights['n_actions'], weights['n_pad']
    mm = weights['mm_dtype']
    h1, h2, h3 = wf1m.shape[1], wf2.shape[1], wf3.shape[1]

    cfg = _tpu_config(mm == jnp.bfloat16)
    TB = batch_tile if batch_tile is not None else _choose_batch_tile(
        B, cfg['cap'], cfg['n_cores'])
    steps = pl.cdiv(B, TB)
    TBW = TB * W
    use_roll = _roll_supported()

    aux = jnp.concatenate([asset_id, account_state], axis=1)             # (B, A+3)

    def kernel(md_ref, aux_ref, w1_ref, w2_ref, w3_ref, waux_ref,
               wf1m_ref, wf1ac_ref, wf2_ref, wf3_ref, wo_ref, b_ref, out_ref):
        bias = lambda i: b_ref[:, slots[i][0]:slots[i][0] + slots[i][1]]

        # Flat (TB*W, F) activations; boundary-row masks hoisted once.
        xf = md_ref[...].reshape(TBW, F)
        t_idx = jax.lax.broadcasted_iota(jnp.int32, (TBW, 1), 0) % W
        is_t0 = t_idx == 0
        is_tl = t_idx == (W - 1)

        def shift(x, s):
            # rows move by +s (row i <- row i-s); boundary rows masked by caller
            if use_roll:
                return pltpu.roll(x, s, 0)
            if s > 0:
                return jnp.concatenate([x[:1], x[:-1]], axis=0)
            return jnp.concatenate([x[1:], x[-1:]], axis=0)

        def conv_relu(x, w_ref, b):
            xp = jnp.where(is_t0, 0.0, shift(x, 1))      # x[t-1], zero at t=0
            xn = jnp.where(is_tl, 0.0, shift(x, -1))     # x[t+1], zero at t=W-1
            h = (jnp.dot(xp.astype(mm), w_ref[0], preferred_element_type=jnp.float32)
                 + jnp.dot(x.astype(mm), w_ref[1], preferred_element_type=jnp.float32)
                 + jnp.dot(xn.astype(mm), w_ref[2], preferred_element_type=jnp.float32)
                 + b)
            return jnp.maximum(h, 0.0)

        h = conv_relu(xf, w1_ref, bias(0))                # (TBW, 32)
        h = conv_relu(h, w2_ref, bias(1))                 # (TBW, 64)
        h = conv_relu(h, w3_ref, bias(2))                 # (TBW, 128)
        x1 = jnp.mean(h.reshape(TB, W, 128), axis=1)      # AdaptiveAvgPool1d(1)

        # joint asset/account encoder (block-diagonal weight)
        x23 = jnp.maximum(
            jnp.dot(aux_ref[...].astype(mm), waux_ref[...],
                    preferred_element_type=jnp.float32) + bias(3), 0.0)   # (TB, 64)

        # fc stack on the implicit concat [x1 | x23]
        f = (jnp.dot(x1.astype(mm), wf1m_ref[...], preferred_element_type=jnp.float32)
             + jnp.dot(x23.astype(mm), wf1ac_ref[...], preferred_element_type=jnp.float32)
             + bias(4))
        f = jnp.maximum(f, 0.0)
        f = jnp.maximum(jnp.dot(f.astype(mm), wf2_ref[...],
                                preferred_element_type=jnp.float32) + bias(5), 0.0)
        f = jnp.maximum(jnp.dot(f.astype(mm), wf3_ref[...],
                                preferred_element_type=jnp.float32) + bias(6), 0.0)
        logits = jnp.dot(f.astype(mm), wo_ref[...],
                         preferred_element_type=jnp.float32) + bias(7)

        # Padded batch rows of a partial last tile: keep them finite (discarded).
        row = jax.lax.broadcasted_iota(jnp.int32, (TB, 1), 0) + pl.program_id(0) * TB
        logits = jnp.where(row < B, logits, 0.0)

        # softmax(dim=-1) with exact division (PPO probabilities sum to 1)
        m = jnp.max(logits, axis=-1, keepdims=True)
        e = jnp.exp(logits - m)
        out_ref[...] = (e / jnp.sum(e, axis=-1, keepdims=True)).astype(out_ref.dtype)

    in_specs = ([pl.BlockSpec((TB, W, F), lambda b: (b, 0, 0)),
                 pl.BlockSpec((TB, A + 3), lambda b: (b, 0))]
                + [_bcast_spec(a) for a in arrays])

    # Advisory cost estimate (weights counted once: constant index maps).
    conv_flops = 2 * W * 3 * (F * 32 + 32 * 64 + 64 * 128)
    fc_flops = 2 * ((A + 3) * 64 + 128 * h1 + 64 * h1 + h1 * h2 + h2 * h3 + h3 * n_pad)
    flops = int(B) * int(conv_flops + fc_flops)
    w_bytes = sum(int(a.size) * a.dtype.itemsize for a in arrays)
    io_bytes = 4 * (int(market.size) + int(aux.size) + int(B) * int(n_pad))
    cost = pl.CostEstimate(flops=flops, transcendentals=int(B) * int(n_pad),
                           bytes_accessed=int(io_bytes + w_bytes))

    out = pl.pallas_call(
        kernel,
        out_shape=jax.ShapeDtypeStruct((B, n_pad), jnp.float32),
        grid=(steps,),
        in_specs=in_specs,
        out_specs=pl.BlockSpec((TB, n_pad), lambda b: (b, 0)),
        compiler_params=pltpu.CompilerParams(
            dimension_semantics=("parallel",),
            vmem_limit_bytes=cfg['vmem_limit']),
        cost_estimate=cost,
    )(market, aux, *arrays)
    return out[:, :n_actions]


# ----------------------------------------------------------------------------
# Params + pure-JAX reference (matches PyTorch forward semantics)
# ----------------------------------------------------------------------------
def init_params(key, n_features, n_assets, n_actions, hidden_dims=(512, 256, 128)):
    h1, h2, h3 = hidden_dims
    ks = jax.random.split(key, 18)

    def w(k, shape, scale=0.1):
        return scale * jax.random.normal(k, shape, jnp.float32)

    return {
        'w1': w(ks[0], (3, n_features, 32)), 'b1': w(ks[1], (1, 32), 0.01),
        'w2': w(ks[2], (3, 32, 64)),         'b2': w(ks[3], (1, 64), 0.01),
        'w3': w(ks[4], (3, 64, 128)),        'b3': w(ks[5], (1, 128), 0.01),
        'wa': w(ks[6], (n_assets, 32)),      'ba': w(ks[7], (1, 32), 0.01),
        'wc': w(ks[8], (3, 32)),             'bc': w(ks[9], (1, 32), 0.01),
        'wf1': w(ks[10], (192, h1)),         'bf1': w(ks[11], (1, h1), 0.01),
        'wf2': w(ks[12], (h1, h2)),          'bf2': w(ks[13], (1, h2), 0.01),
        'wf3': w(ks[14], (h2, h3)),          'bf3': w(ks[15], (1, h3), 0.01),
        'wo': w(ks[16], (h3, n_actions)),    'bo': w(ks[17], (1, n_actions), 0.01),
    }


def ref_forward(market, asset_id, account_state, p):
    def conv(x, w, b):
        xp = jnp.pad(x, ((0, 0), (1, 1), (0, 0)))
        Wt = x.shape[1]
        h = sum(jnp.einsum('bwc,cd->bwd', xp[:, k:k + Wt, :], w[k]) for k in range(3)) + b
        return jax.nn.relu(h)

    h = conv(market, p['w1'], p['b1'])
    h = conv(h, p['w2'], p['b2'])
    h = conv(h, p['w3'], p['b3'])
    x1 = h.mean(axis=1)                                  # AdaptiveAvgPool1d(1) + flatten
    x2 = jax.nn.relu(asset_id @ p['wa'] + p['ba'])
    x3 = jax.nn.relu(account_state @ p['wc'] + p['bc'])
    x = jnp.concatenate([x1, x2, x3], axis=1)
    f = jax.nn.relu(x @ p['wf1'] + p['bf1'])
    f = jax.nn.relu(f @ p['wf2'] + p['bf2'])
    f = jax.nn.relu(f @ p['wf3'] + p['bf3'])
    logits = f @ p['wo'] + p['bo']
    return jax.nn.softmax(logits, axis=-1)


# ----------------------------------------------------------------------------
if __name__ == "__main__":
    B, W, F = 2, 16, 8                    # batch, window_size, n_features
    n_assets, n_actions = 8, 4

    key = jax.random.PRNGKey(0)
    k_md, k_aid, k_acct, k_param, k_extra = jax.random.split(key, 5)

    market = jax.random.normal(k_md, (B, W, F), jnp.float32)
    asset_id = jax.random.normal(k_aid, (B, n_assets), jnp.float32)
    account = jax.random.normal(k_acct, (B, 3), jnp.float32)

    params = init_params(k_param, F, n_assets, n_actions)
    ref = jax.block_until_ready(ref_forward(market, asset_id, account, params))

    # f32 path (exact softmax division -> tight tolerance, rows sum to 1)
    weights = prepare_weights(params)
    out = jax.block_until_ready(actor_forward(market, asset_id, account, weights))
    np.testing.assert_allclose(np.asarray(out), np.asarray(ref), rtol=1e-3, atol=1e-4)
    np.testing.assert_allclose(np.asarray(out).sum(axis=-1), np.ones(B), atol=1e-4)

    # multi-step grid with a partial last batch tile
    B2 = 40
    km, ka, kc = jax.random.split(k_extra, 3)
    market2 = jax.random.normal(km, (B2, W, F), jnp.float32)
    asset2 = jax.random.normal(ka, (B2, n_assets), jnp.float32)
    account2 = jax.random.normal(kc, (B2, 3), jnp.float32)
    ref2 = jax.block_until_ready(ref_forward(market2, asset2, account2, params))
    out2 = jax.block_until_ready(
        actor_forward(market2, asset2, account2, weights, batch_tile=16))
    np.testing.assert_allclose(np.asarray(out2), np.asarray(ref2), rtol=1e-3, atol=1e-4)

    # bf16 matmul path (MXU inputs bf16, f32 accumulation)
    weights_bf16 = prepare_weights(params, use_bf16=True)
    out3 = jax.block_until_ready(actor_forward(market2, asset2, account2, weights_bf16))
    np.testing.assert_allclose(np.asarray(out3), np.asarray(ref2), rtol=5e-2, atol=3e-2)
    np.testing.assert_allclose(np.asarray(out3).sum(axis=-1), np.ones(B2), atol=1e-3)

    print("KERNEL_OK")
</pallas_src>

<mosaic_0001>
module attributes {stable_mosaic.version = 11 : i64} {
  func.func @kernel(%arg0: i32, %arg1: memref<2x16x8xf32, #tpu.memory_space<vmem>>, %arg2: memref<2x11xf32, #tpu.memory_space<vmem>>, %arg3: memref<3x8x32xf32, #tpu.memory_space<vmem>>, %arg4: memref<3x32x64xf32, #tpu.memory_space<vmem>>, %arg5: memref<3x64x128xf32, #tpu.memory_space<vmem>>, %arg6: memref<11x64xf32, #tpu.memory_space<vmem>>, %arg7: memref<128x512xf32, #tpu.memory_space<vmem>>, %arg8: memref<64x512xf32, #tpu.memory_space<vmem>>, %arg9: memref<512x256xf32, #tpu.memory_space<vmem>>, %arg10: memref<256x128xf32, #tpu.memory_space<vmem>>, %arg11: memref<128x128xf32, #tpu.memory_space<vmem>>, %arg12: memref<1x1536xf32, #tpu.memory_space<vmem>>, %arg13: memref<2x128xf32, #tpu.memory_space<vmem>>) attributes {dimension_semantics = [#tpu.dimension_semantics<parallel>], iteration_bounds = array<i64: 1>, scalar_prefetch = 0 : i64, scratch_operands = 0 : i64, tpu.core_type = #tpu.core_type<tc>, window_params = [{transform_indices = @transform_0, window_bounds = array<i64: 2, 16, 8>}, {transform_indices = @transform_1, window_bounds = array<i64: 2, 11>}, {pipeline_mode = #tpu.pipeline_mode<synchronous>, transform_indices = @transform_2, window_bounds = array<i64: 3, 8, 32>}, {pipeline_mode = #tpu.pipeline_mode<synchronous>, transform_indices = @transform_3, window_bounds = array<i64: 3, 32, 64>}, {pipeline_mode = #tpu.pipeline_mode<synchronous>, transform_indices = @transform_4, window_bounds = array<i64: 3, 64, 128>}, {pipeline_mode = #tpu.pipeline_mode<synchronous>, transform_indices = @transform_5, window_bounds = array<i64: 11, 64>}, {pipeline_mode = #tpu.pipeline_mode<synchronous>, transform_indices = @transform_6, window_bounds = array<i64: 128, 512>}, {pipeline_mode = #tpu.pipeline_mode<synchronous>, transform_indices = @transform_7, window_bounds = array<i64: 64, 512>}, {pipeline_mode = #tpu.pipeline_mode<synchronous>, transform_indices = @transform_8, window_bounds = array<i64: 512, 256>}, {pipeline_mode = #tpu.pipeline_mode<synchronous>, transform_indices = @transform_9, window_bounds = array<i64: 256, 128>}, {pipeline_mode = #tpu.pipeline_mode<synchronous>, transform_indices = @transform_10, window_bounds = array<i64: 128, 128>}, {pipeline_mode = #tpu.pipeline_mode<synchronous>, transform_indices = @transform_11, window_bounds = array<i64: 1, 1536>}, {transform_indices = @transform_12, window_bounds = array<i64: 2, 128>}]} {
    %c0 = arith.constant 0 : index
    %c0_0 = arith.constant 0 : index
    %c0_1 = arith.constant 0 : index
    %0 = vector.load %arg1[%c0, %c0_0, %c0_1] : memref<2x16x8xf32, #tpu.memory_space<vmem>>, vector<2x16x8xf32>
    %1 = vector.shape_cast %0 : vector<2x16x8xf32> to vector<32x8xf32>
    %2 = tpu.iota {dimensions = array<i32: 0>} : vector<32x1xi32>
    %c16_i32 = arith.constant 16 : i32
    %c0_i32 = arith.constant 0 : i32
    %3 = arith.cmpi eq, %c16_i32, %c0_i32 : i32
    %c1_i32 = arith.constant 1 : i32
    %4 = arith.select %3, %c1_i32, %c16_i32 : i32
    %5 = vector.broadcast %4 : i32 to vector<32x1xi32>
    %6 = arith.remsi %2, %5 : vector<32x1xi32>
    %c0_i32_2 = arith.constant 0 : i32
    %7 = vector.broadcast %c0_i32_2 : i32 to vector<32x1xi32>
    %8 = arith.cmpi ne, %6, %7 : vector<32x1xi32>
    %c0_i32_3 = arith.constant 0 : i32
    %9 = vector.broadcast %c0_i32_3 : i32 to vector<32x1xi32>
    %10 = arith.cmpi slt, %6, %9 : vector<32x1xi32>
    %c0_i32_4 = arith.constant 0 : i32
    %11 = arith.cmpi slt, %4, %c0_i32_4 : i32
    %12 = vector.broadcast %11 : i1 to vector<32x1xi1>
    %13 = vector.broadcast %12 : vector<32x1xi1> to vector<32x1xi1>
    %14 = arith.xori %10, %13 : vector<32x1xi1>
    %15 = arith.andi %14, %8 : vector<32x1xi1>
    %16 = vector.broadcast %4 : i32 to vector<32x1xi32>
    %17 = arith.addi %6, %16 : vector<32x1xi32>
    %18 = arith.select %15, %17, %6 : vector<32x1xi1>, vector<32x1xi32>
    %c0_i32_5 = arith.constant 0 : i32
    %19 = vector.broadcast %c0_i32_5 : i32 to vector<32x1xi32>
    %20 = arith.cmpi eq, %18, %19 : vector<32x1xi32>
    %c15_i32 = arith.constant 15 : i32
    %21 = vector.broadcast %c15_i32 : i32 to vector<32x1xi32>
    %22 = arith.cmpi eq, %18, %21 : vector<32x1xi32>
    %c0_6 = arith.constant 0 : index
    %c0_7 = arith.constant 0 : index
    %23 = vector.load %arg12[%c0_6, %c0_7] : memref<1x1536xf32, #tpu.memory_space<vmem>>, vector<1x32xf32>
    %24 = vector.extract_strided_slice %1 {offsets = [0, 0], sizes = [1, 8], strides = [1, 1]} : vector<32x8xf32> to vector<1x8xf32>
    %25 = vector.extract_strided_slice %1 {offsets = [0, 0], sizes = [31, 8], strides = [1, 1]} : vector<32x8xf32> to vector<31x8xf32>
    %26 = tpu.concatenate %24, %25 in 0 : vector<1x8xf32>, vector<31x8xf32> -> vector<32x8xf32>
    %cst = arith.constant 0.000000e+00 : f32
    %27 = vector.shape_cast %20 : vector<32x1xi1> to vector<32x1xi1>
    %28 = vector.broadcast %27 : vector<32x1xi1> to vector<32x8xi1>
    %29 = vector.broadcast %cst : f32 to vector<32x8xf32>
    %30 = arith.select %28, %29, %26 : vector<32x8xi1>, vector<32x8xf32>
    %31 = vector.extract_strided_slice %1 {offsets = [1, 0], sizes = [31, 8], strides = [1, 1]} : vector<32x8xf32> to vector<31x8xf32>
    %32 = vector.extract_strided_slice %1 {offsets = [31, 0], sizes = [1, 8], strides = [1, 1]} : vector<32x8xf32> to vector<1x8xf32>
    %33 = tpu.concatenate %31, %32 in 0 : vector<31x8xf32>, vector<1x8xf32> -> vector<32x8xf32>
    %cst_8 = arith.constant 0.000000e+00 : f32
    %34 = vector.shape_cast %22 : vector<32x1xi1> to vector<32x1xi1>
    %35 = vector.broadcast %34 : vector<32x1xi1> to vector<32x8xi1>
    %36 = vector.broadcast %cst_8 : f32 to vector<32x8xf32>
    %37 = arith.select %35, %36, %33 : vector<32x8xi1>, vector<32x8xf32>
    %c0_9 = arith.constant 0 : index
    %c0_10 = arith.constant 0 : index
    %c0_11 = arith.constant 0 : index
    %38 = vector.load %arg3[%c0_9, %c0_10, %c0_11] : memref<3x8x32xf32, #tpu.memory_space<vmem>>, vector<1x8x32xf32>
    %39 = vector.shape_cast %38 : vector<1x8x32xf32> to vector<8x32xf32>
    %cst_12 = arith.constant dense<0.000000e+00> : vector<32x32xf32>
    %40 = tpu.matmul %30, %39, %cst_12 {dimension_numbers = #tpu.dot_dimension_numbers<[1], [0], [0], [1], [0, 0, 1, 1], [], []>} : vector<32x8xf32>, vector<8x32xf32>, vector<32x32xf32> -> vector<32x32xf32>
    %c1 = arith.constant 1 : index
    %c0_13 = arith.constant 0 : index
    %c0_14 = arith.constant 0 : index
    %41 = vector.load %arg3[%c1, %c0_13, %c0_14] : memref<3x8x32xf32, #tpu.memory_space<vmem>>, vector<1x8x32xf32>
    %42 = vector.shape_cast %41 : vector<1x8x32xf32> to vector<8x32xf32>
    %cst_15 = arith.constant dense<0.000000e+00> : vector<32x32xf32>
    %43 = tpu.matmul %1, %42, %cst_15 {dimension_numbers = #tpu.dot_dimension_numbers<[1], [0], [0], [1], [0, 0, 1, 1], [], []>} : vector<32x8xf32>, vector<8x32xf32>, vector<32x32xf32> -> vector<32x32xf32>
    %44 = arith.addf %40, %43 : vector<32x32xf32>
    %c2 = arith.constant 2 : index
    %c0_16 = arith.constant 0 : index
    %c0_17 = arith.constant 0 : index
    %45 = vector.load %arg3[%c2, %c0_16, %c0_17] : memref<3x8x32xf32, #tpu.memory_space<vmem>>, vector<1x8x32xf32>
    %46 = vector.shape_cast %45 : vector<1x8x32xf32> to vector<8x32xf32>
    %cst_18 = arith.constant dense<0.000000e+00> : vector<32x32xf32>
    %47 = tpu.matmul %37, %46, %cst_18 {dimension_numbers = #tpu.dot_dimension_numbers<[1], [0], [0], [1], [0, 0, 1, 1], [], []>} : vector<32x8xf32>, vector<8x32xf32>, vector<32x32xf32> -> vector<32x32xf32>
    %48 = arith.addf %44, %47 : vector<32x32xf32>
    %49 = vector.broadcast %23 : vector<1x32xf32> to vector<32x32xf32>
    %50 = arith.addf %48, %49 : vector<32x32xf32>
    %cst_19 = arith.constant 0.000000e+00 : f32
    %51 = vector.broadcast %cst_19 : f32 to vector<32x32xf32>
    %52 = arith.maximumf %50, %51 : vector<32x32xf32>
    %c0_20 = arith.constant 0 : index
    %c128 = arith.constant 128 : index
    %53 = vector.load %arg12[%c0_20, %c128] : memref<1x1536xf32, #tpu.memory_space<vmem>>, vector<1x64xf32>
    %54 = vector.extract_strided_slice %52 {offsets = [0, 0], sizes = [1, 32], strides = [1, 1]} : vector<32x32xf32> to vector<1x32xf32>
    %55 = vector.extract_strided_slice %52 {offsets = [0, 0], sizes = [31, 32], strides = [1, 1]} : vector<32x32xf32> to vector<31x32xf32>
    %56 = tpu.concatenate %54, %55 in 0 : vector<1x32xf32>, vector<31x32xf32> -> vector<32x32xf32>
    %cst_21 = arith.constant 0.000000e+00 : f32
    %57 = vector.shape_cast %20 : vector<32x1xi1> to vector<32x1xi1>
    %58 = vector.broadcast %57 : vector<32x1xi1> to vector<32x32xi1>
    %59 = vector.broadcast %cst_21 : f32 to vector<32x32xf32>
    %60 = arith.select %58, %59, %56 : vector<32x32xi1>, vector<32x32xf32>
    %61 = vector.extract_strided_slice %52 {offsets = [1, 0], sizes = [31, 32], strides = [1, 1]} : vector<32x32xf32> to vector<31x32xf32>
    %62 = vector.extract_strided_slice %52 {offsets = [31, 0], sizes = [1, 32], strides = [1, 1]} : vector<32x32xf32> to vector<1x32xf32>
    %63 = tpu.concatenate %61, %62 in 0 : vector<31x32xf32>, vector<1x32xf32> -> vector<32x32xf32>
    %cst_22 = arith.constant 0.000000e+00 : f32
    %64 = vector.shape_cast %22 : vector<32x1xi1> to vector<32x1xi1>
    %65 = vector.broadcast %64 : vector<32x1xi1> to vector<32x32xi1>
    %66 = vector.broadcast %cst_22 : f32 to vector<32x32xf32>
    %67 = arith.select %65, %66, %63 : vector<32x32xi1>, vector<32x32xf32>
    %c0_23 = arith.constant 0 : index
    %c0_24 = arith.constant 0 : index
    %c0_25 = arith.constant 0 : index
    %68 = vector.load %arg4[%c0_23, %c0_24, %c0_25] : memref<3x32x64xf32, #tpu.memory_space<vmem>>, vector<1x32x64xf32>
    %69 = vector.shape_cast %68 : vector<1x32x64xf32> to vector<32x64xf32>
    %cst_26 = arith.constant dense<0.000000e+00> : vector<32x64xf32>
    %70 = tpu.matmul %60, %69, %cst_26 {dimension_numbers = #tpu.dot_dimension_numbers<[1], [0], [0], [1], [0, 0, 1, 1], [], []>} : vector<32x32xf32>, vector<32x64xf32>, vector<32x64xf32> -> vector<32x64xf32>
    %c1_27 = arith.constant 1 : index
    %c0_28 = arith.constant 0 : index
    %c0_29 = arith.constant 0 : index
    %71 = vector.load %arg4[%c1_27, %c0_28, %c0_29] : memref<3x32x64xf32, #tpu.memory_space<vmem>>, vector<1x32x64xf32>
    %72 = vector.shape_cast %71 : vector<1x32x64xf32> to vector<32x64xf32>
    %cst_30 = arith.constant dense<0.000000e+00> : vector<32x64xf32>
    %73 = tpu.matmul %52, %72, %cst_30 {dimension_numbers = #tpu.dot_dimension_numbers<[1], [0], [0], [1], [0, 0, 1, 1], [], []>} : vector<32x32xf32>, vector<32x64xf32>, vector<32x64xf32> -> vector<32x64xf32>
    %74 = arith.addf %70, %73 : vector<32x64xf32>
    %c2_31 = arith.constant 2 : index
    %c0_32 = arith.constant 0 : index
    %c0_33 = arith.constant 0 : index
    %75 = vector.load %arg4[%c2_31, %c0_32, %c0_33] : memref<3x32x64xf32, #tpu.memory_space<vmem>>, vector<1x32x64xf32>
    %76 = vector.shape_cast %75 : vector<1x32x64xf32> to vector<32x64xf32>
    %cst_34 = arith.constant dense<0.000000e+00> : vector<32x64xf32>
    %77 = tpu.matmul %67, %76, %cst_34 {dimension_numbers = #tpu.dot_dimension_numbers<[1], [0], [0], [1], [0, 0, 1, 1], [], []>} : vector<32x32xf32>, vector<32x64xf32>, vector<32x64xf32> -> vector<32x64xf32>
    %78 = arith.addf %74, %77 : vector<32x64xf32>
    %79 = vector.broadcast %53 : vector<1x64xf32> to vector<32x64xf32>
    %80 = arith.addf %78, %79 : vector<32x64xf32>
    %cst_35 = arith.constant 0.000000e+00 : f32
    %81 = vector.broadcast %cst_35 : f32 to vector<32x64xf32>
    %82 = arith.maximumf %80, %81 : vector<32x64xf32>
    %c0_36 = arith.constant 0 : index
    %c256 = arith.constant 256 : index
    %83 = vector.load %arg12[%c0_36, %c256] : memref<1x1536xf32, #tpu.memory_space<vmem>>, vector<1x128xf32>
    %84 = vector.extract_strided_slice %82 {offsets = [0, 0], sizes = [1, 64], strides = [1, 1]} : vector<32x64xf32> to vector<1x64xf32>
    %85 = vector.extract_strided_slice %82 {offsets = [0, 0], sizes = [31, 64], strides = [1, 1]} : vector<32x64xf32> to vector<31x64xf32>
    %86 = tpu.concatenate %84, %85 in 0 : vector<1x64xf32>, vector<31x64xf32> -> vector<32x64xf32>
    %cst_37 = arith.constant 0.000000e+00 : f32
    %87 = vector.shape_cast %20 : vector<32x1xi1> to vector<32x1xi1>
    %88 = vector.broadcast %87 : vector<32x1xi1> to vector<32x64xi1>
    %89 = vector.broadcast %cst_37 : f32 to vector<32x64xf32>
    %90 = arith.select %88, %89, %86 : vector<32x64xi1>, vector<32x64xf32>
    %91 = vector.extract_strided_slice %82 {offsets = [1, 0], sizes = [31, 64], strides = [1, 1]} : vector<32x64xf32> to vector<31x64xf32>
    %92 = vector.extract_strided_slice %82 {offsets = [31, 0], sizes = [1, 64], strides = [1, 1]} : vector<32x64xf32> to vector<1x64xf32>
    %93 = tpu.concatenate %91, %92 in 0 : vector<31x64xf32>, vector<1x64xf32> -> vector<32x64xf32>
    %cst_38 = arith.constant 0.000000e+00 : f32
    %94 = vector.shape_cast %22 : vector<32x1xi1> to vector<32x1xi1>
    %95 = vector.broadcast %94 : vector<32x1xi1> to vector<32x64xi1>
    %96 = vector.broadcast %cst_38 : f32 to vector<32x64xf32>
    %97 = arith.select %95, %96, %93 : vector<32x64xi1>, vector<32x64xf32>
    %c0_39 = arith.constant 0 : index
    %c0_40 = arith.constant 0 : index
    %c0_41 = arith.constant 0 : index
    %98 = vector.load %arg5[%c0_39, %c0_40, %c0_41] : memref<3x64x128xf32, #tpu.memory_space<vmem>>, vector<1x64x128xf32>
    %99 = vector.shape_cast %98 : vector<1x64x128xf32> to vector<64x128xf32>
    %cst_42 = arith.constant dense<0.000000e+00> : vector<32x128xf32>
    %100 = tpu.matmul %90, %99, %cst_42 {dimension_numbers = #tpu.dot_dimension_numbers<[1], [0], [0], [1], [0, 0, 1, 1], [], []>} : vector<32x64xf32>, vector<64x128xf32>, vector<32x128xf32> -> vector<32x128xf32>
    %c1_43 = arith.constant 1 : index
    %c0_44 = arith.constant 0 : index
    %c0_45 = arith.constant 0 : index
    %101 = vector.load %arg5[%c1_43, %c0_44, %c0_45] : memref<3x64x128xf32, #tpu.memory_space<vmem>>, vector<1x64x128xf32>
    %102 = vector.shape_cast %101 : vector<1x64x128xf32> to vector<64x128xf32>
    %cst_46 = arith.constant dense<0.000000e+00> : vector<32x128xf32>
    %103 = tpu.matmul %82, %102, %cst_46 {dimension_numbers = #tpu.dot_dimension_numbers<[1], [0], [0], [1], [0, 0, 1, 1], [], []>} : vector<32x64xf32>, vector<64x128xf32>, vector<32x128xf32> -> vector<32x128xf32>
    %104 = arith.addf %100, %103 : vector<32x128xf32>
    %c2_47 = arith.constant 2 : index
    %c0_48 = arith.constant 0 : index
    %c0_49 = arith.constant 0 : index
    %105 = vector.load %arg5[%c2_47, %c0_48, %c0_49] : memref<3x64x128xf32, #tpu.memory_space<vmem>>, vector<1x64x128xf32>
    %106 = vector.shape_cast %105 : vector<1x64x128xf32> to vector<64x128xf32>
    %cst_50 = arith.constant dense<0.000000e+00> : vector<32x128xf32>
    %107 = tpu.matmul %97, %106, %cst_50 {dimension_numbers = #tpu.dot_dimension_numbers<[1], [0], [0], [1], [0, 0, 1, 1], [], []>} : vector<32x64xf32>, vector<64x128xf32>, vector<32x128xf32> -> vector<32x128xf32>
    %108 = arith.addf %104, %107 : vector<32x128xf32>
    %109 = vector.broadcast %83 : vector<1x128xf32> to vector<32x128xf32>
    %110 = arith.addf %108, %109 : vector<32x128xf32>
    %cst_51 = arith.constant 0.000000e+00 : f32
    %111 = vector.broadcast %cst_51 : f32 to vector<32x128xf32>
    %112 = arith.maximumf %110, %111 : vector<32x128xf32>
    %113 = vector.shape_cast %112 : vector<32x128xf32> to vector<2x16x128xf32>
    %cst_52 = arith.constant dense<0.000000e+00> : vector<2x128xf32>
    %114 = vector.multi_reduction <add>, %113, %cst_52 [1] : vector<2x16x128xf32> to vector<2x128xf32>
    %cst_53 = arith.constant 1.600000e+01 : f32
    %115 = vector.broadcast %cst_53 : f32 to vector<2x128xf32>
    %116 = arith.divf %114, %115 : vector<2x128xf32>
    %c0_54 = arith.constant 0 : index
    %c0_55 = arith.constant 0 : index
    %117 = vector.load %arg2[%c0_54, %c0_55] : memref<2x11xf32, #tpu.memory_space<vmem>>, vector<2x11xf32>
    %c0_56 = arith.constant 0 : index
    %c0_57 = arith.constant 0 : index
    %118 = vector.load %arg6[%c0_56, %c0_57] : memref<11x64xf32, #tpu.memory_space<vmem>>, vector<11x64xf32>
    %cst_58 = arith.constant dense<0.000000e+00> : vector<2x64xf32>
    %119 = tpu.matmul %117, %118, %cst_58 {dimension_numbers = #tpu.dot_dimension_numbers<[1], [0], [0], [1], [0, 0, 1, 1], [], []>} : vector<2x11xf32>, vector<11x64xf32>, vector<2x64xf32> -> vector<2x64xf32>
    %c0_59 = arith.constant 0 : index
    %c384 = arith.constant 384 : index
    %120 = vector.load %arg12[%c0_59, %c384] : memref<1x1536xf32, #tpu.memory_space<vmem>>, vector<1x64xf32>
    %121 = vector.broadcast %120 : vector<1x64xf32> to vector<2x64xf32>
    %122 = arith.addf %119, %121 : vector<2x64xf32>
    %cst_60 = arith.constant 0.000000e+00 : f32
    %123 = vector.broadcast %cst_60 : f32 to vector<2x64xf32>
    %124 = arith.maximumf %122, %123 : vector<2x64xf32>
    %c0_61 = arith.constant 0 : index
    %c0_62 = arith.constant 0 : index
    %125 = vector.load %arg7[%c0_61, %c0_62] : memref<128x512xf32, #tpu.memory_space<vmem>>, vector<128x512xf32>
    %cst_63 = arith.constant dense<0.000000e+00> : vector<2x512xf32>
    %126 = tpu.matmul %116, %125, %cst_63 {dimension_numbers = #tpu.dot_dimension_numbers<[1], [0], [0], [1], [0, 0, 1, 1], [], []>} : vector<2x128xf32>, vector<128x512xf32>, vector<2x512xf32> -> vector<2x512xf32>
    %c0_64 = arith.constant 0 : index
    %c0_65 = arith.constant 0 : index
    %127 = vector.load %arg8[%c0_64, %c0_65] : memref<64x512xf32, #tpu.memory_space<vmem>>, vector<64x512xf32>
    %cst_66 = arith.constant dense<0.000000e+00> : vector<2x512xf32>
    %128 = tpu.matmul %124, %127, %cst_66 {dimension_numbers = #tpu.dot_dimension_numbers<[1], [0], [0], [1], [0, 0, 1, 1], [], []>} : vector<2x64xf32>, vector<64x512xf32>, vector<2x512xf32> -> vector<2x512xf32>
    %129 = arith.addf %126, %128 : vector<2x512xf32>
    %c0_67 = arith.constant 0 : index
    %c512 = arith.constant 512 : index
    %130 = vector.load %arg12[%c0_67, %c512] : memref<1x1536xf32, #tpu.memory_space<vmem>>, vector<1x512xf32>
    %131 = vector.broadcast %130 : vector<1x512xf32> to vector<2x512xf32>
    %132 = arith.addf %129, %131 : vector<2x512xf32>
    %cst_68 = arith.constant 0.000000e+00 : f32
    %133 = vector.broadcast %cst_68 : f32 to vector<2x512xf32>
    %134 = arith.maximumf %132, %133 : vector<2x512xf32>
    %c0_69 = arith.constant 0 : index
    %c0_70 = arith.constant 0 : index
    %135 = vector.load %arg9[%c0_69, %c0_70] : memref<512x256xf32, #tpu.memory_space<vmem>>, vector<512x256xf32>
    %cst_71 = arith.constant dense<0.000000e+00> : vector<2x256xf32>
    %136 = tpu.matmul %134, %135, %cst_71 {dimension_numbers = #tpu.dot_dimension_numbers<[1], [0], [0], [1], [0, 0, 1, 1], [], []>} : vector<2x512xf32>, vector<512x256xf32>, vector<2x256xf32> -> vector<2x256xf32>
    %c0_72 = arith.constant 0 : index
    %c1024 = arith.constant 1024 : index
    %137 = vector.load %arg12[%c0_72, %c1024] : memref<1x1536xf32, #tpu.memory_space<vmem>>, vector<1x256xf32>
    %138 = vector.broadcast %137 : vector<1x256xf32> to vector<2x256xf32>
    %139 = arith.addf %136, %138 : vector<2x256xf32>
    %cst_73 = arith.constant 0.000000e+00 : f32
    %140 = vector.broadcast %cst_73 : f32 to vector<2x256xf32>
    %141 = arith.maximumf %139, %140 : vector<2x256xf32>
    %c0_74 = arith.constant 0 : index
    %c0_75 = arith.constant 0 : index
    %142 = vector.load %arg10[%c0_74, %c0_75] : memref<256x128xf32, #tpu.memory_space<vmem>>, vector<256x128xf32>
    %cst_76 = arith.constant dense<0.000000e+00> : vector<2x128xf32>
    %143 = tpu.matmul %141, %142, %cst_76 {dimension_numbers = #tpu.dot_dimension_numbers<[1], [0], [0], [1], [0, 0, 1, 1], [], []>} : vector<2x256xf32>, vector<256x128xf32>, vector<2x128xf32> -> vector<2x128xf32>
    %c0_77 = arith.constant 0 : index
    %c1280 = arith.constant 1280 : index
    %144 = vector.load %arg12[%c0_77, %c1280] : memref<1x1536xf32, #tpu.memory_space<vmem>>, vector<1x128xf32>
    %145 = vector.broadcast %144 : vector<1x128xf32> to vector<2x128xf32>
    %146 = arith.addf %143, %145 : vector<2x128xf32>
    %cst_78 = arith.constant 0.000000e+00 : f32
    %147 = vector.broadcast %cst_78 : f32 to vector<2x128xf32>
    %148 = arith.maximumf %146, %147 : vector<2x128xf32>
    %c0_79 = arith.constant 0 : index
    %c0_80 = arith.constant 0 : index
    %149 = vector.load %arg11[%c0_79, %c0_80] : memref<128x128xf32, #tpu.memory_space<vmem>>, vector<128x128xf32>
    %cst_81 = arith.constant dense<0.000000e+00> : vector<2x128xf32>
    %150 = tpu.matmul %148, %149, %cst_81 {dimension_numbers = #tpu.dot_dimension_numbers<[1], [0], [0], [1], [0, 0, 1, 1], [], []>} : vector<2x128xf32>, vector<128x128xf32>, vector<2x128xf32> -> vector<2x128xf32>
    %c0_82 = arith.constant 0 : index
    %c1408 = arith.constant 1408 : index
    %151 = vector.load %arg12[%c0_82, %c1408] : memref<1x1536xf32, #tpu.memory_space<vmem>>, vector<1x128xf32>
    %152 = vector.broadcast %151 : vector<1x128xf32> to vector<2x128xf32>
    %153 = arith.addf %150, %152 : vector<2x128xf32>
    %154 = tpu.iota {dimensions = array<i32: 0>} : vector<2x1xi32>
    %c2_i32 = arith.constant 2 : i32
    %155 = arith.muli %arg0, %c2_i32 : i32
    %156 = vector.broadcast %155 : i32 to vector<2x1xi32>
    %157 = arith.addi %154, %156 : vector<2x1xi32>
    %c2_i32_83 = arith.constant 2 : i32
    %158 = vector.broadcast %c2_i32_83 : i32 to vector<2x1xi32>
    %159 = arith.cmpi slt, %157, %158 : vector<2x1xi32>
    %cst_84 = arith.constant 0.000000e+00 : f32
    %160 = vector.shape_cast %159 : vector<2x1xi1> to vector<2x1xi1>
    %161 = vector.broadcast %160 : vector<2x1xi1> to vector<2x128xi1>
    %162 = vector.broadcast %cst_84 : f32 to vector<2x128xf32>
    %163 = arith.select %161, %153, %162 : vector<2x128xi1>, vector<2x128xf32>
    %cst_85 = arith.constant dense<0xFF800000> : vector<2xf32>
    %164 = vector.multi_reduction <maximumf>, %163, %cst_85 [1] : vector<2x128xf32> to vector<2xf32>
    %165 = vector.shape_cast %164 : vector<2xf32> to vector<2x1xf32>
    %166 = vector.broadcast %165 : vector<2x1xf32> to vector<2x128xf32>
    %167 = arith.subf %163, %166 : vector<2x128xf32>
    %168 = math.exp %167 : vector<2x128xf32>
    %cst_86 = arith.constant dense<0.000000e+00> : vector<2xf32>
    %169 = vector.multi_reduction <add>, %168, %cst_86 [1] : vector<2x128xf32> to vector<2xf32>
    %170 = vector.shape_cast %169 : vector<2xf32> to vector<2x1xf32>
    %171 = vector.broadcast %170 : vector<2x1xf32> to vector<2x128xf32>
    %172 = arith.divf %168, %171 : vector<2x128xf32>
    %c0_87 = arith.constant 0 : index
    %c0_88 = arith.constant 0 : index
    %173 = vector.load %arg13[%c0_87, %c0_88] : memref<2x128xf32, #tpu.memory_space<vmem>>, vector<2x128xf32>
    tpu.vector_store %arg13[%c0_87, %c0_88], %172 {strides = array<i32>} : memref<2x128xf32, #tpu.memory_space<vmem>>, vector<2x128xf32>,
    return
  }
  func.func @transform_0(%arg0: i32) -> (i32, i32, i32) {
    %c0_i32 = arith.constant 0 : i32
    %c0_i32_0 = arith.constant 0 : i32
    %c0_i32_1 = arith.constant 0 : i32
    return %arg0, %c0_i32, %c0_i32_0 : i32, i32, i32
  }
  func.func @transform_1(%arg0: i32) -> (i32, i32) {
    %c0_i32 = arith.constant 0 : i32
    %c0_i32_0 = arith.constant 0 : i32
    return %arg0, %c0_i32 : i32, i32
  }
  func.func @transform_2(%arg0: i32) -> (i32, i32, i32) {
    %c0_i32 = arith.constant 0 : i32
    %c0_i32_0 = arith.constant 0 : i32
    %c0_i32_1 = arith.constant 0 : i32
    %c0_i32_2 = arith.constant 0 : i32
    return %c0_i32, %c0_i32_0, %c0_i32_1 : i32, i32, i32
  }
  func.func @transform_3(%arg0: i32) -> (i32, i32, i32) {
    %c0_i32 = arith.constant 0 : i32
    %c0_i32_0 = arith.constant 0 : i32
    %c0_i32_1 = arith.constant 0 : i32
    %c0_i32_2 = arith.constant 0 : i32
    return %c0_i32, %c0_i32_0, %c0_i32_1 : i32, i32, i32
  }
  func.func @transform_4(%arg0: i32) -> (i32, i32, i32) {
    %c0_i32 = arith.constant 0 : i32
    %c0_i32_0 = arith.constant 0 : i32
    %c0_i32_1 = arith.constant 0 : i32
    %c0_i32_2 = arith.constant 0 : i32
    return %c0_i32, %c0_i32_0, %c0_i32_1 : i32, i32, i32
  }
  func.func @transform_5(%arg0: i32) -> (i32, i32) {
    %c0_i32 = arith.constant 0 : i32
    %c0_i32_0 = arith.constant 0 : i32
    %c0_i32_1 = arith.constant 0 : i32
    return %c0_i32, %c0_i32_0 : i32, i32
  }
  func.func @transform_6(%arg0: i32) -> (i32, i32) {
    %c0_i32 = arith.constant 0 : i32
    %c0_i32_0 = arith.constant 0 : i32
    %c0_i32_1 = arith.constant 0 : i32
    return %c0_i32, %c0_i32_0 : i32, i32
  }
  func.func @transform_7(%arg0: i32) -> (i32, i32) {
    %c0_i32 = arith.constant 0 : i32
    %c0_i32_0 = arith.constant 0 : i32
    %c0_i32_1 = arith.constant 0 : i32
    return %c0_i32, %c0_i32_0 : i32, i32
  }
  func.func @transform_8(%arg0: i32) -> (i32, i32) {
    %c0_i32 = arith.constant 0 : i32
    %c0_i32_0 = arith.constant 0 : i32
    %c0_i32_1 = arith.constant 0 : i32
    return %c0_i32, %c0_i32_0 : i32, i32
  }
  func.func @transform_9(%arg0: i32) -> (i32, i32) {
    %c0_i32 = arith.constant 0 : i32
    %c0_i32_0 = arith.constant 0 : i32
    %c0_i32_1 = arith.constant 0 : i32
    return %c0_i32, %c0_i32_0 : i32, i32
  }
  func.func @transform_10(%arg0: i32) -> (i32, i32) {
    %c0_i32 = arith.constant 0 : i32
    %c0_i32_0 = arith.constant 0 : i32
    %c0_i32_1 = arith.constant 0 : i32
    return %c0_i32, %c0_i32_0 : i32, i32
  }
  func.func @transform_11(%arg0: i32) -> (i32, i32) {
    %c0_i32 = arith.constant 0 : i32
    %c0_i32_0 = arith.constant 0 : i32
    %c0_i32_1 = arith.constant 0 : i32
    return %c0_i32, %c0_i32_0 : i32, i32
  }
  func.func @transform_12(%arg0: i32) -> (i32, i32) {
    %c0_i32 = arith.constant 0 : i32
    %c0_i32_0 = arith.constant 0 : i32
    return %arg0, %c0_i32 : i32, i32
  }
}

</mosaic_0001>

<bundles_post_ra>
// kernel: tpu_custom_call.1
= control target key start
LH: loop header
LB: loop body
LE: loop exit
PB: predicated region body
PF: predicated region fallthrough
CT: control target
= control target key end

     0   :  { %17 = vsyncpa [#allocation3], 0  ;;  %s2212_s0 = inlined_call_operand.vmem [shape: f32[2,16,8], index: 0, kind: input, shape index: {}]   ;;  %s2213_s1 = inlined_call_operand.hbm [shape: f32[2,11], index: 1, kind: input, shape index: {}]   ;;  %s2214_s2 = inlined_call_operand.vmem [shape: f32[3,8,32], index: 2, kind: input, shape index: {}]   ;;  %s2215_s3 = inlined_call_operand.hbm [shape: f32[3,32,64], index: 3, kind: input, shape index: {}]   ;;  %s2216_s4 = inlined_call_operand.hbm [shape: f32[3,64,128], index: 4, kind: input, shape index: {}]   ;;  %s2217_s5 = inlined_call_operand.vmem [shape: f32[11,64], index: 5, kind: input, shape index: {}]   ;;  %s2218_s6 = inlined_call_operand.hbm [shape: f32[128,512], index: 6, kind: input, shape index: {}]   ;;  %s2219_s7 = inlined_call_operand.hbm [shape: f32[64,512], index: 7, kind: input, shape index: {}]   ;;  %s2220_s8 = inlined_call_operand.hbm [shape: f32[512,256], index: 8, kind: input, shape index: {}]   ;;  %s2221_s9 = inlined_call_operand.hbm [shape: f32[256,128], index: 9, kind: input, shape index: {}]   ;;  %s2222_s10 = inlined_call_operand.hbm [shape: f32[128,128], index: 10, kind: input, shape index: {}]   ;;  %s2223_s11 = inlined_call_operand.vmem [shape: f32[1,1536], index: 11, kind: input, shape index: {}]   ;;  %s2224_s12 = inlined_call_operand.hbm [shape: f32[2,128], index: 12, kind: output, shape index: {}]  }
   0x1   :  { %18 = vsyncpa [#allocation6], 0 }
   0x2   :  { %19 = vsyncpa [#allocation9], 0 }
   0x3   :  { %20 = vsyncpa [#allocation12], 0 }
   0x4   :  { %21 = vsyncpa [#allocation15], 0  ;;  %s42_s23 = sshll.u32 %s2215_s3, 4  ;;  %s43_s23 = int_to_ptr.hbm [resolvable:$true] %s42_s23 }
   0x5   :  { %22 = vsyncpa [#allocation4], 0  ;;  %s1917_s24 = smov [#allocation5]   ;;  %s70_s28 = sshll.u32 %s2218_s6, 4  ;;  %s71_s28 = int_to_ptr.hbm [resolvable:$true] %s70_s28 }
   0x6   :  { %s44_s25 = sshll.u32 %s1917_s24, 4  ;;  %s1918_s29 = smov 128   ;;  %s45_s25 = int_to_ptr.vmem [resolvable:$true] %s44_s25 }
   0x7   :  { %s1919_s30 = smov 8   ;;  %s1920_s13 = smov [#allocation8]  }
   0x8   :  { %50 = dma.hbm_to_vmem [thread:$0]  %s43_s23, 1536, %s45_s25, [#allocation6], %s1918_s29, %s1918_s29, %s1919_s30  }
   0x9   :  { %s72_s14 = sshll.u32 %s1920_s13, 4  ;;  %s1921_s3 = smov 512   ;;  %s73_s14 = int_to_ptr.vmem [resolvable:$true] %s72_s14 }
   0xa   :  { %s1922_s15 = smov 32   ;;  %s96_s6 = sshll.u32 %s2220_s8, 4  ;;  %s97_s6 = int_to_ptr.hbm [resolvable:$true] %s96_s6 }
   0xb   :  { %78 = dma.hbm_to_vmem [thread:$0]  %s71_s28, 8192, %s73_s14, [#allocation9], %s1921_s3, %s1921_s3, %s1922_s15  }
   0xc   :  { %s1923_s18 = smov [#allocation11]   ;;  %s30_s22 = sshll.u32 %s2213_s1, 4  ;;  %s31_s22 = int_to_ptr.hbm [resolvable:$true] %s30_s22 }
   0xd   :  { %s98_s19 = sshll.u32 %s1923_s18, 4  ;;  %s1924_s23 = smov 256   ;;  %s99_s19 = int_to_ptr.vmem [resolvable:$true] %s98_s19 }
   0xe   :  { %s1925_s24 = smov 16   ;;  %s1926_s25 = smov [#allocation2]  }
   0xf   :  { %104 = dma.hbm_to_vmem [thread:$0]  %s97_s6, 16384, %s99_s19, [#allocation12], %s1924_s23, %s1924_s23, %s1925_s24  }
  0x10   :  { %s32_s26 = sshll.u32 %s1926_s25, 4  ;;  %s55_s13 = sshll.u32 %s2216_s4, 4  ;;  %s33_s26 = int_to_ptr.vmem [resolvable:$true] %s32_s26  ;;  %s56_s13 = int_to_ptr.hbm [resolvable:$true] %s55_s13 }
  0x11   :  { %35 = dma.hbm_to_vmem [thread:$0]  %s31_s22, 32, %s33_s26, [#allocation3]  }
  0x12   :  { %s83_s16 = sshll.u32 %s2219_s7, 4  ;;  %s1927_s17 = smov [#allocation7]   ;;  %s84_s16 = int_to_ptr.hbm [resolvable:$true] %s83_s16 }
  0x13   :  { %s57_s18 = sshll.u32 %s1927_s17, 4  ;;  %s1928_s1 = smov [#allocation10]   ;;  %s58_s18 = int_to_ptr.vmem [resolvable:$true] %s57_s18 }
  0x14   :  { %63 = dma.hbm_to_vmem [thread:$0]  %s56_s13, 3072, %s58_s18, [#allocation6], %s1918_s29, %s1918_s29, %s1919_s30  }
  0x15   :  { %s85_s6 = sshll.u32 %s1928_s1, 4  ;;  %s109_s4 = sshll.u32 %s2221_s9, 4  ;;  %s86_s6 = int_to_ptr.vmem [resolvable:$true] %s85_s6  ;;  %s110_s4 = int_to_ptr.hbm [resolvable:$true] %s109_s4 }
  0x16   :  { %91 = dma.hbm_to_vmem [thread:$0]  %s84_s16, 4096, %s86_s6, [#allocation9], %s1921_s3, %s1921_s3, %s1922_s15  }
  0x17   :  { %s122_s22 = sshll.u32 %s2222_s10, 4  ;;  %s1929_s23 = smov [#allocation13]   ;;  %s123_s22 = int_to_ptr.hbm [resolvable:$true] %s122_s22 }
  0x18   :  { %s111_s24 = sshll.u32 %s1929_s23, 4  ;;  %s1930_s25 = smov [#allocation14]   ;;  %s112_s24 = int_to_ptr.vmem [resolvable:$true] %s111_s24 }
  0x19   :  { %117 = dma.hbm_to_vmem [thread:$0]  %s110_s4, 4096, %s112_s24, [#allocation12], %s1918_s29, %s1918_s29, %s1919_s30  }
  0x1a   :  { %s124_s9 = sshll.u32 %s1930_s25, 4  ;;  %s125_s9 = int_to_ptr.vmem [resolvable:$true] %s124_s9 }
  0x1b   :  { %130 = dma.hbm_to_vmem [thread:$0]  %s123_s22, 2048, %s125_s9, [#allocation15], %s1918_s29, %s1918_s29, %s1919_s30  }
  0x1c   :  { %1905 = dma.done.wait [#allocation3], 32  }
  0x1d   :  { %1906 = vsyncadd [#allocation3], 4294967264 }
  0x1e   :  { %1907 = dma.done.wait [#allocation6], 4608  }
  0x1f   :  { %1908 = vsyncadd [#allocation6], 4294962688 }
  0x20   :  { %1909 = dma.done.wait [#allocation9], 12288  }
  0x21   :  { %1910 = vsyncadd [#allocation9], 4294955008 }
  0x22   :  { %1911 = dma.done.wait [#allocation12], 20480  }
  0x23   :  { %1912 = vsyncadd [#allocation12], 4294946816 }
  0x24   :  { %1913 = dma.done.wait [#allocation15], 2048  }
  0x25   :  { %1914 = vsyncadd [#allocation15], 4294965248  ;;  %v169_v0 = vlaneseq  ;;  %vm260_vm0 = vcmask 1046528   ;;  %v1626_v4 = vld [vmem:[%s2214_s2 + $0x10] sm:$0xff]  ;;  %v165_v5 = vld [vmem:[%s2212_s0] sm:$0xff]  ;;  %vm288_vm1 = vcmask 64512  }
  0x26   :  { %v166_v6 = vld [vmem:[%s2212_s0 + $0x8] sm:$0xff]  ;;  %vm235_vm3 = vcmask 1040384   ;;  %396 = vmatpush.msra.mxu2 %v1626_v4  ;;  %v261_v8 = vrot.slane %v165_v5, 1  ;;  %v285_v11 = vld [vmem:[%s2214_s2] sm:$0xff]  ;;  %v236_v12 = vrot.slane %v165_v5, 7  ;;  %v167_v13 = vld [vmem:[%s2212_s0 + $0x10] sm:$0xff] }
  0x27   :  { %v2040_v1 = vshrl.u32 %v169_v0, 7  ;;  %v262_v9 = vrot.slane %v166_v6, 1  ;;  %v1617_v10 = vld [vmem:[%s2214_s2 + $0x8] sm:$0xff]  ;;  %353 = vmatpush.msra.mxu1 %v285_v11  ;;  %v264_v15 = vrot.slane %v167_v13, 1  ;;  %v465_v16 = vld [vmem:[#allocation5 + $0x18] sm:$0xff]  ;;  %v464_v20 = vld [vmem:[#allocation5 + $0x10] sm:$0xff] }
  0x28   :  { %312 = vmatpush.msra.mxu0 %v1617_v10  ;;  %v247_v18 = vsel %vm235_vm3, %v165_v5, %v236_v12  ;;  %v554_v19 = vld [vmem:[#allocation5 + $0x58] sm:$0xff]  ;;  %v553_v22 = vld [vmem:[#allocation5 + $0x50] sm:$0xff]  ;;  %v237_v25 = vrot.slane %v166_v6, 7  ;;  %v239_v31 = vrot.slane %v167_v13, 7  ;;  %v468_v46 = vld [vmem:[#allocation5 + $0x28] sm:$0xff]  ;;  %vm471_vm7 = vcmask 261120  }
  0x29   :  { %v178_v2 = vand.u32 15, %v2040_v1  ;;  %v171_v3 = vadd.s32 8, %v2040_v1  ;;  %v263_v17 = vsel %vm260_vm0, %v261_v8, %v262_v9  ;;  %1618 = vmatmul.msk.f32.vlgmr.msra.gmra.mxu0 %vm288_vm1, %v165_v5  ;;  %v265_v24 = vsel %vm260_vm0, %v262_v9, %v264_v15  ;;  %579 = vmatpush.msrb.mxu1 %v554_v19  ;;  %v168_v29 = vld [vmem:[%s2212_s0 + $0x18] sm:$0xff]  ;;  %v463_v47 = vld [vmem:[#allocation5 + $0x8] sm:$0xff]  ;;  %v467_v49 = vld [vmem:[#allocation5 + $0x20] sm:$0xff]  ;;  %s1603_s13 = sshll.u32 %s2224_s12, 4  ;;  %s1604_s13 = int_to_ptr.hbm [resolvable:$true] %s1603_s13 }
  0x2a   :  { %1627 = vmatmul.msk.f32.vlgmr.msra.gmra.mxu2 %vm288_vm1, %v263_v17  ;;  %533 = vmatpush.msrb.mxu0 %v465_v16  ;;  %v172_v26 = vadd.s32 16, %v2040_v1  ;;  %v238_v28 = vsel %vm235_vm3, %v236_v12, %v237_v25  ;;  %v266_v32 = vrot.slane %v168_v29, 1  ;;  %v173_v33 = vadd.s32 24, %v2040_v1  ;;  %v470_v44 = vld [vmem:[#allocation5 + $0x38] sm:$0xff]  ;;  %v469_v45 = vld [vmem:[#allocation5 + $0x30] sm:$0xff]  ;;  %v552_v48 = vld [vmem:[#allocation5 + $0x48] sm:$0xff] }
  0x2b   :  { %vm2053_vm2 = vcmp.eq.s32.totalorder %v178_v2, 0  ;;  %v185_v14 = vand.u32 15, %v171_v3  ;;  %580 = vmatpush.msrb.mxu1 %v553_v22  ;;  %v240_v35 = vsel %vm235_vm3, %v237_v25, %v239_v31  ;;  %v241_v41 = vrot.slane %v168_v29, 7  ;;  %492 = vmatpush.msra.mxu3 %v470_v44  ;;  %v462_v50 = vld [vmem:[#allocation5] sm:$0xff]  ;;  %v1677_v55 = vld [vmem:[%s2223_s11] ss:$0 sm:$0xff] }
  0x2c   :  { %v256_v21 = vsel %vm2053_vm2, 0.0, %v247_v18  ;;  %534 = vmatpush.msrb.mxu0 %v464_v20  ;;  %v192_v30 = vand.u32 15, %v172_v26  ;;  %v267_v36 = vsel %vm260_vm0, %v264_v15, %v266_v32  ;;  %v199_v38 = vand.u32 15, %v173_v33  ;;  %v551_v51 = vld [vmem:[#allocation5 + $0x40] sm:$0xff]  ;;  %v664_v9 = vld [vmem:[#allocation7 + $0x78] sm:$0xff]  ;;  %v663_v10 = vld [vmem:[#allocation7 + $0x70] sm:$0xff] }
  0x2d   :  { %1622 = vmatmul.msk.f32.vlgmr.msra.gmra.mxu1 %vm288_vm1, %v256_v21  ;;  %vm2073_vm4 = vcmp.eq.s32.totalorder %v185_v14, 15  ;;  %v272_v40 = vsel %vm260_vm0, %v266_v32, %v168_v29  ;;  %v242_v43 = vsel %vm235_vm3, %v239_v31, %v241_v41  ;;  %493 = vmatpush.msra.mxu3 %v469_v45  ;;  %v655_v11 = vld [vmem:[#allocation7 + $0x38] sm:$0xff]  ;;  %v662_v14 = vld [vmem:[#allocation7 + $0x68] sm:$0xff]  ;;  %v661_v18 = vld [vmem:[#allocation7 + $0x60] sm:$0xff]  ;;  %vm843_vm8 = vcmask 1042432  }
  0x2e   :  { %v282_v27 = vsel %vm2073_vm4, 0.0, %v265_v24  ;;  %vm2089_vm5 = vcmp.eq.s32.totalorder %v192_v30, 0  ;;  %vm2100_vm6 = vcmp.eq.s32.totalorder %v199_v38, 15  ;;  %535 = vmatpush.msrb.mxu0 %v463_v47  ;;  %581 = vmatpush.msrb.mxu1 %v552_v48  ;;  %v660_v24 = vld [vmem:[#allocation7 + $0x58] sm:$0xff]  ;;  %v654_v48 = vld [vmem:[#allocation7 + $0x30] sm:$0xff]  ;;  %vm665_vm9 = vcmask 523264  }
  0x2f   :  { %v258_v37 = vsel %vm2089_vm5, 0.0, %v240_v35  ;;  %v284_v42 = vsel %vm2100_vm6, 0.0, %v272_v40  ;;  %494 = vmatpush.msra.mxu3 %v468_v46  ;;  %682 = vmatpush.msrb.mxu2 %v664_v9  ;;  %v1678_v9 = vld [vmem:[%s2223_s11 + $0x1] ss:$0 sm:$0xff]  ;;  %vm839_vm10 = vcmask 89088   ;;  %v948_v39 = vld [vmem:[#allocation10 + $0x80] sm:$0xff] }
  0x30   :  { %536 = vmatpush.msrb.mxu0 %v462_v50  ;;  %582 = vmatpush.msrb.mxu1 %v551_v51  ;;  %v653_v50 = vld [vmem:[#allocation7 + $0x28] sm:$0xff]  ;;  %v752_v51 = vld [vmem:[#allocation7 + $0xb8] sm:$0xff]  ;;  %vm1049_vm12 = vcmask 1041409   ;;  %vm1566_vm13 = vcmp.lt.s32.totalorder %v2040_v1, 2  ;;  %vm1570_vm14 = vcmask 1041408  }
  0x31   :  { %1619 = vmatmul.msk.f32.gmra.mxu0 %vm288_vm1, %v166_v6  ;;  %495 = vmatpush.msra.mxu3 %v467_v49  ;;  %v659_v49 = vld [vmem:[#allocation7 + $0x50] sm:$0xff]  ;;  %v832_v23 = vld [vmem:[#allocation2] sm:$0x3] }
  0x32   :  { %1628 = vmatmul.msk.f32.gmra.mxu2 %vm288_vm1, %v282_v27  ;;  %773 = vmatpush.msra.mxu0 %v752_v51 }
  0x33   :  { %723 = vmatpush.msrb.mxu3 %v655_v11  ;;  %683 = vmatpush.msrb.mxu2 %v663_v10 }
  0x35   :  { %1623 = vmatmul.msk.f32.gmra.mxu1 %vm288_vm1, %v238_v28  ;;  %684 = vmatpush.msrb.mxu2 %v662_v14 }
  0x36   :  { %724 = vmatpush.msrb.mxu3 %v654_v48 }
  0x37   :  { %685 = vmatpush.msrb.mxu2 %v661_v18 }
  0x38   :  { %725 = vmatpush.msrb.mxu3 %v653_v50 }
  0x39   :  { %1620 = vmatmul.msk.f32.gmra.mxu0 %vm288_vm1, %v167_v13  ;;  %686 = vmatpush.msrb.mxu2 %v660_v24 }
  0x3a   :  { %1629 = vmatmul.msk.f32.gmra.mxu2 %vm288_vm1, %v267_v36 }
  0x3b   :  { %687 = vmatpush.msrb.mxu2 %v659_v49 }
  0x3d   :  { %1624 = vmatmul.msk.f32.gmra.mxu1 %vm288_vm1, %v258_v37 }
  0x41   :  { %1621 = vmatmul.msk.f32.gmra.mxu0 %vm288_vm1, %v168_v29 }
  0x42   :  { %1630 = vmatmul.msk.f32.gmra.mxu2 %vm288_vm1, %v284_v42 }
  0x45   :  { %1625 = vmatmul.msk.f32.gmra.mxu1 %vm288_vm1, %v242_v43 }
  0xa6   :  { %v314_v52 = vpop.f32.mrf.mxu0 }
  0xaa   :  { %v355_v53 = vpop.f32.mrf.mxu1 }
  0xab   :  { %v356_v54 = vadd.f32 %v355_v53, %v314_v52  ;;  %v652_v52 = vld [vmem:[#allocation7 + $0x20] sm:$0xff]  ;;  %v658_v53 = vld [vmem:[#allocation7 + $0x48] sm:$0xff] }
  0xac   :  { %726 = vmatpush.msrb.mxu3 %v652_v52  ;;  %688 = vmatpush.msrb.mxu2 %v658_v53 }
  0xad   :  { %v398_v56 = vpop.f32.mrf.mxu2 }
  0xae   :  { %v410_v57 = vadd.f32 %v398_v56, %v356_v54  ;;  %v317_v58 = vpop.f32.mrf.mxu0  ;;  %v651_v54 = vld [vmem:[#allocation7 + $0x18] sm:$0xff]  ;;  %v657_v56 = vld [vmem:[#allocation7 + $0x40] sm:$0xff] }
  0xaf   :  { %727 = vmatpush.msrb.mxu3 %v651_v54  ;;  %689 = vmatpush.msrb.mxu2 %v657_v56  ;;  %v960_v56 = vld [vmem:[#allocation10 + $0xe0] sm:$0xff] }
  0xb0   :  { %v417_v59 = vadd.f32 %v1677_v55, %v410_v57  ;;  %v650_v57 = vld [vmem:[#allocation7 + $0x10] sm:$0xff] }
  0xb1   :  { %728 = vmatpush.msrb.mxu3 %v650_v57  ;;  %v961_v57 = vld [vmem:[#allocation10 + $0xe8] sm:$0xff] }
  0xb2   :  { %v358_v60 = vpop.f32.mrf.mxu1  ;;  %v421_v61 = vmax.f32 %v417_v59, 0.0  ;;  %v649_v59 = vld [vmem:[#allocation7 + $0x8] sm:$0xff] }
  0xb3   :  { %v359_v62 = vadd.f32 %v358_v60, %v317_v58  ;;  %v750_v58 = vld [vmem:[#allocation7 + $0xa8] sm:$0xff]  ;;  %729 = vmatpush.msrb.mxu3 %v649_v59  ;;  %v956_v59 = vld [vmem:[#allocation10 + $0xc0] sm:$0xff] }
  0xb4   :  { %1631 = vmatmul.msk.f32.vlgmr.msra.gmra.mxu3 %vm471_vm7, %v421_v61  ;;  %v430_v63 = vrot.slane %v421_v61, 7  ;;  %v446_v16 = vrot.slane %v421_v61, 1  ;;  %v834_v60 = vld [vmem:[%s2217_s5 + $0x8] sm:$0x7] }
  0xb5   :  { %v401_v0 = vpop.f32.mrf.mxu2  ;;  %1655 = vmatpush.msk.msra.mxu2 %vm843_vm8, %v834_v60  ;;  %v957_v60 = vld [vmem:[#allocation10 + $0xc8] sm:$0xff] }
  0xb6   :  { %v411_v2 = vadd.f32 %v401_v0, %v359_v62  ;;  %v441_v3 = vsel %vm235_vm3, %v421_v61, %v430_v63  ;;  %v320_v4 = vpop.f32.mrf.mxu0  ;;  %v648_v61 = vld [vmem:[#allocation7] sm:$0xff]  ;;  %v747_v0 = vld [vmem:[#allocation7 + $0x90] sm:$0xff] }
  0xb7   :  { %v442_v5 = vsel %vm2053_vm2, 0.0, %v441_v3  ;;  %v749_v62 = vld [vmem:[#allocation7 + $0xa0] sm:$0xff]  ;;  %730 = vmatpush.msrb.mxu3 %v648_v61  ;;  %v958_v61 = vld [vmem:[#allocation10 + $0xd0] sm:$0xff] }
  0xb8   :  { %v418_v6 = vadd.f32 %v1677_v55, %v411_v2  ;;  %1635 = vmatmul.msk.f32.vlgmr.msrb.gmra.mxu0 %vm471_vm7, %v442_v5  ;;  %v746_v2 = vld [vmem:[#allocation7 + $0x88] sm:$0xff]  ;;  %v745_v3 = vld [vmem:[#allocation7 + $0x80] sm:$0xff] }
  0xb9   :  { %995 = vmatpush.msra.mxu3 %v961_v57  ;;  %v892_v57 = vld [vmem:[#allocation8 + $0xc0] sm:$0xff] }
  0xba   :  { %v361_v8 = vpop.f32.mrf.mxu1  ;;  %v422_v12 = vmax.f32 %v418_v6, 0.0 }
  0xbb   :  { %v362_v13 = vadd.f32 %v361_v8, %v320_v4  ;;  %v833_v4 = vld [vmem:[%s2217_s5] sm:$0xff]  ;;  %996 = vmatpush.msra.mxu3 %v957_v60 }
  0xbc   :  { %v447_v15 = vrot.slane %v422_v12, 1  ;;  %1632 = vmatmul.msk.f32.gmra.mxu3 %vm471_vm7, %v422_v12  ;;  %v431_v17 = vrot.slane %v422_v12, 7  ;;  %862 = vmatpush.msra.mxu2 %v833_v4  ;;  %v944_v4 = vld [vmem:[#allocation10 + $0x60] sm:$0xff] }
  0xbd   :  { %v404_v19 = vpop.f32.mrf.mxu2 }
  0xbe   :  { %v412_v20 = vadd.f32 %v404_v19, %v362_v13  ;;  %v448_v21 = vsel %vm260_vm0, %v446_v16, %v447_v15  ;;  %v432_v22 = vsel %vm235_vm3, %v430_v63, %v431_v17  ;;  %v323_v25 = vpop.f32.mrf.mxu0  ;;  %v748_v63 = vld [vmem:[#allocation7 + $0x98] sm:$0xff] }
  0xbf   :  { %1639 = vmatmul.msk.f32.vlgmr.msrb.gmra.mxu1 %vm471_vm7, %v448_v21 }
  0xc0   :  { %v419_v26 = vadd.f32 %v1677_v55, %v412_v20  ;;  %1636 = vmatmul.msk.f32.gmra.mxu0 %vm471_vm7, %v432_v22 }
  0xc2   :  { %v364_v27 = vpop.f32.mrf.mxu1  ;;  %v423_v28 = vmax.f32 %v419_v26, 0.0 }
  0xc3   :  { %v365_v29 = vadd.f32 %v364_v27, %v323_v25 }
  0xc4   :  { %1633 = vmatmul.msk.f32.gmra.mxu3 %vm471_vm7, %v423_v28  ;;  %v433_v30 = vrot.slane %v423_v28, 7  ;;  %v449_v31 = vrot.slane %v423_v28, 1 }
  0xc5   :  { %v407_v32 = vpop.f32.mrf.mxu2 }
  0xc6   :  { %v413_v33 = vadd.f32 %v407_v32, %v365_v29  ;;  %v434_v35 = vsel %vm235_vm3, %v431_v17, %v433_v30  ;;  %v450_v36 = vsel %vm260_vm0, %v447_v15, %v449_v31 }
  0xc7   :  { %v444_v37 = vsel %vm2089_vm5, 0.0, %v434_v35  ;;  %v459_v38 = vsel %vm2073_vm4, 0.0, %v450_v36 }
  0xc8   :  { %v420_v40 = vadd.f32 %v1677_v55, %v413_v33  ;;  %1637 = vmatmul.msk.f32.gmra.mxu0 %vm471_vm7, %v444_v37  ;;  %1640 = vmatmul.msk.f32.gmra.mxu1 %vm471_vm7, %v459_v38  ;;  %v751_v55 = vld [vmem:[#allocation7 + $0xb0] sm:$0xff] }
  0xc9   :  { %774 = vmatpush.msra.mxu0 %v751_v55 }
  0xca   :  { %v424_v41 = vmax.f32 %v420_v40, 0.0 }
  0xcb   :  { %775 = vmatpush.msra.mxu0 %v750_v58  ;;  %v962_v58 = vld [vmem:[#allocation10 + $0xf0] sm:$0xff] }
  0xcc   :  { %1634 = vmatmul.msk.f32.gmra.mxu3 %vm471_vm7, %v424_v41  ;;  %v435_v42 = vrot.slane %v424_v41, 7  ;;  %v451_v43 = vrot.slane %v424_v41, 1  ;;  %1015 = vmatpush.msra.mxu1 %v962_v58  ;;  %v893_v58 = vld [vmem:[#allocation8 + $0xc8] sm:$0xff] }
  0xcd   :  { %776 = vmatpush.msra.mxu0 %v749_v62  ;;  %v952_v62 = vld [vmem:[#allocation10 + $0xa0] sm:$0xff] }
  0xce   :  { %v436_v44 = vsel %vm235_vm3, %v433_v30, %v435_v42  ;;  %v452_v45 = vsel %vm260_vm0, %v449_v31, %v451_v43  ;;  %v457_v46 = vsel %vm260_vm0, %v451_v43, %v424_v41  ;;  %1016 = vmatpush.msra.mxu1 %v958_v61  ;;  %v888_v61 = vld [vmem:[#allocation8 + $0xa0] sm:$0xff] }
  0xcf   :  { %v461_v47 = vsel %vm2100_vm6, 0.0, %v457_v46  ;;  %777 = vmatpush.msra.mxu0 %v748_v63  ;;  %v953_v63 = vld [vmem:[#allocation10 + $0xa8] sm:$0xff] }
  0xd0   :  { %1638 = vmatmul.msk.f32.gmra.mxu0 %vm471_vm7, %v436_v44  ;;  %1641 = vmatmul.msk.f32.gmra.mxu1 %vm471_vm7, %v452_v45 }
  0xd1   :  { %778 = vmatpush.msra.mxu0 %v747_v0  ;;  %v954_v0 = vld [vmem:[#allocation10 + $0xb0] sm:$0xff]  ;;  %997 = vmatpush.msra.mxu3 %v953_v63 }
  0xd2   :  { %1017 = vmatpush.msra.mxu1 %v954_v0  ;;  %v890_v63 = vld [vmem:[#allocation8 + $0xb0] sm:$0xff]  ;;  %v1679_v0 = vld [vmem:[%s2223_s11 + $0x2] ss:$0 sm:$0xff] }
  0xd3   :  { %779 = vmatpush.msra.mxu0 %v746_v2  ;;  %v949_v2 = vld [vmem:[#allocation10 + $0x88] sm:$0xff] }
  0xd4   :  { %998 = vmatpush.msra.mxu3 %v949_v2 }
  0xd5   :  { %780 = vmatpush.msra.mxu0 %v745_v3  ;;  %v950_v3 = vld [vmem:[#allocation10 + $0x90] sm:$0xff] }
  0xd6   :  { %1018 = vmatpush.msra.mxu1 %v950_v3  ;;  %v884_v3 = vld [vmem:[#allocation8 + $0x80] sm:$0xff] }
  0xd8   :  { %1642 = vmatmul.msk.f32.gmra.mxu1 %vm471_vm7, %v461_v47 }
 0x135   :  { %v538_v5 = vpop.f32.mrf.mxu0 }
 0x137   :  { %v497_v6 = vpop.f32.mrf.mxu3 }
 0x138   :  { %v539_v8 = vadd.f32 %v538_v5, %v497_v6  ;;  %v945_v5 = vld [vmem:[#allocation10 + $0x68] sm:$0xff]  ;;  %v946_v6 = vld [vmem:[#allocation10 + $0x70] sm:$0xff] }
 0x139   :  { %999 = vmatpush.msra.mxu3 %v945_v5  ;;  %1019 = vmatpush.msra.mxu1 %v946_v6  ;;  %v886_v5 = vld [vmem:[#allocation8 + $0x90] sm:$0xff] }
 0x13c   :  { %v584_v10 = vpop.f32.mrf.mxu1 }
 0x13d   :  { %v596_v11 = vadd.f32 %v584_v10, %v539_v8  ;;  %v541_v13 = vpop.f32.mrf.mxu0  ;;  %v940_v8 = vld [vmem:[#allocation10 + $0x40] sm:$0xff]  ;;  %v942_v10 = vld [vmem:[#allocation10 + $0x50] sm:$0xff] }
 0x13e   :  { %1020 = vmatpush.msra.mxu1 %v942_v10  ;;  %v881_v10 = vld [vmem:[#allocation8 + $0x68] sm:$0xff] }
 0x13f   :  { %v603_v12 = vadd.f32 %v1678_v9, %v596_v11  ;;  %v500_v14 = vpop.f32.mrf.mxu3  ;;  %v936_v11 = vld [vmem:[#allocation10 + $0x20] sm:$0xff] }
 0x140   :  { %v542_v17 = vadd.f32 %v541_v13, %v500_v14  ;;  %v938_v13 = vld [vmem:[#allocation10 + $0x30] sm:$0xff]  ;;  %v932_v14 = vld [vmem:[#allocation10] sm:$0xff] }
 0x141   :  { %v607_v15 = vmax.f32 %v603_v12, 0.0  ;;  %v937_v12 = vld [vmem:[#allocation10 + $0x28] sm:$0xff]  ;;  %1021 = vmatpush.msra.mxu1 %v938_v13  ;;  %v876_v13 = vld [vmem:[#allocation8 + $0x40] sm:$0xff] }
 0x143   :  { %1643 = vmatmul.msk.f32.vlgmr.msrb.gmra.mxu2 %vm665_vm9, %v607_v15  ;;  %v616_v16 = vrot.slane %v607_v15, 7  ;;  %v632_v30 = vrot.slane %v607_v15, 1 }
 0x144   :  { %975 = vmatpush.msrb.mxu2 %v960_v56 }
 0x145   :  { %v587_v18 = vpop.f32.mrf.mxu1  ;;  %v627_v19 = vsel %vm235_vm3, %v607_v15, %v616_v16  ;;  %v544_v25 = vpop.f32.mrf.mxu0  ;;  %v933_v15 = vld [vmem:[#allocation10 + $0x8] sm:$0xff] }
 0x146   :  { %v597_v20 = vadd.f32 %v587_v18, %v542_v17  ;;  %v628_v21 = vsel %vm2053_vm2, 0.0, %v627_v19  ;;  %976 = vmatpush.msrb.mxu2 %v956_v59  ;;  %v963_v17 = vld [vmem:[#allocation10 + $0xf8] sm:$0xff]  ;;  %v928_v18 = vld [vmem:[#allocation8 + $0x1e0] sm:$0xff]  ;;  %v929_v19 = vld [vmem:[#allocation8 + $0x1e8] sm:$0xff] }
 0x147   :  { %v503_v22 = vpop.f32.mrf.mxu3  ;;  %1647 = vmatmul.msk.f32.vlgmr.msrb.gmra.mxu3 %vm665_vm9, %v628_v21  ;;  %1052 = vmatpush.msrb.mxu0 %v928_v18  ;;  %v959_v21 = vld [vmem:[#allocation10 + $0xd8] sm:$0xff]  ;;  %v894_v59 = vld [vmem:[#allocation8 + $0xd0] sm:$0xff]  ;;  %v872_v18 = vld [vmem:[#allocation8 + $0x20] sm:$0xff] }
 0x148   :  { %v604_v24 = vadd.f32 %v1678_v9, %v597_v20  ;;  %v545_v28 = vadd.f32 %v544_v25, %v503_v22  ;;  %977 = vmatpush.msrb.mxu2 %v952_v62  ;;  %v930_v20 = vld [vmem:[#allocation8 + $0x1f0] sm:$0xff]  ;;  %v924_v22 = vld [vmem:[#allocation8 + $0x1c0] sm:$0xff]  ;;  %v889_v62 = vld [vmem:[#allocation8 + $0xa8] sm:$0xff] }
 0x149   :  { %v926_v25 = vld [vmem:[#allocation8 + $0x1d0] sm:$0xff]  ;;  %1053 = vmatpush.msrb.mxu0 %v924_v22 }
 0x14a   :  { %v608_v26 = vmax.f32 %v604_v24, 0.0  ;;  %978 = vmatpush.msrb.mxu2 %v948_v39  ;;  %v925_v24 = vld [vmem:[#allocation8 + $0x1c8] sm:$0xff] }
 0x14c   :  { %v633_v27 = vrot.slane %v608_v26, 1  ;;  %1644 = vmatmul.msk.f32.gmra.mxu2 %vm665_vm9, %v608_v26  ;;  %v617_v29 = vrot.slane %v608_v26, 7  ;;  %v955_v26 = vld [vmem:[#allocation10 + $0xb8] sm:$0xff] }
 0x14d   :  { %v590_v31 = vpop.f32.mrf.mxu1  ;;  %v547_v38 = vpop.f32.mrf.mxu0  ;;  %979 = vmatpush.msrb.mxu2 %v944_v4  ;;  %v885_v4 = vld [vmem:[#allocation8 + $0x88] sm:$0xff] }
 0x14e   :  { %v598_v32 = vadd.f32 %v590_v31, %v545_v28  ;;  %v618_v33 = vsel %vm235_vm3, %v616_v16, %v617_v29  ;;  %v634_v35 = vsel %vm260_vm0, %v632_v30, %v633_v27  ;;  %v934_v16 = vld [vmem:[#allocation10 + $0x10] sm:$0xff]  ;;  %v921_v28 = vld [vmem:[#allocation8 + $0x1a8] sm:$0xff]  ;;  %v951_v30 = vld [vmem:[#allocation10 + $0x98] sm:$0xff] }
 0x14f   :  { %1648 = vmatmul.msk.f32.gmra.mxu3 %vm665_vm9, %v618_v33  ;;  %1651 = vmatmul.msk.f32.vlgmr.msra.gmra.mxu0 %vm665_vm9, %v634_v35  ;;  %v506_v36 = vpop.f32.mrf.mxu3  ;;  %v916_v31 = vld [vmem:[#allocation8 + $0x180] sm:$0xff]  ;;  %v918_v33 = vld [vmem:[#allocation8 + $0x190] sm:$0xff]  ;;  %v947_v35 = vld [vmem:[#allocation10 + $0x78] sm:$0xff] }
 0x150   :  { %v605_v7 = vadd.f32 %v1678_v9, %v598_v32  ;;  %v548_v40 = vadd.f32 %v547_v38, %v506_v36  ;;  %980 = vmatpush.msrb.mxu2 %v940_v8  ;;  %1022 = vmatpush.msra.mxu1 %v934_v16  ;;  %v917_v32 = vld [vmem:[#allocation8 + $0x188] sm:$0xff] }
 0x151   :  { %v913_v36 = vld [vmem:[#allocation8 + $0x168] sm:$0xff] }
 0x152   :  { %v609_v37 = vmax.f32 %v605_v7, 0.0  ;;  %981 = vmatpush.msrb.mxu2 %v936_v11  ;;  %1092 = vmatpush.msrb.mxu1 %v930_v20  ;;  %v912_v7 = vld [vmem:[#allocation8 + $0x160] sm:$0xff]  ;;  %v882_v11 = vld [vmem:[#allocation8 + $0x70] sm:$0xff] }
 0x153   :  { %v874_v20 = vld [vmem:[#allocation8 + $0x30] sm:$0xff] }
 0x154   :  { %1645 = vmatmul.msk.f32.gmra.mxu2 %vm665_vm9, %v609_v37  ;;  %v619_v41 = vrot.slane %v609_v37, 7  ;;  %v635_v42 = vrot.slane %v609_v37, 1  ;;  %1093 = vmatpush.msrb.mxu1 %v926_v25  ;;  %v914_v37 = vld [vmem:[#allocation8 + $0x170] sm:$0xff]  ;;  %v869_v25 = vld [vmem:[#allocation8 + $0x8] sm:$0xff] }
 0x155   :  { %v593_v43 = vpop.f32.mrf.mxu1  ;;  %982 = vmatpush.msrb.mxu2 %v932_v14  ;;  %v877_v14 = vld [vmem:[#allocation8 + $0x48] sm:$0xff] }
 0x156   :  { %v599_v44 = vadd.f32 %v593_v43, %v548_v40  ;;  %v620_v45 = vsel %vm235_vm3, %v617_v29, %v619_v41  ;;  %v636_v46 = vsel %vm260_vm0, %v633_v27, %v635_v42  ;;  %v920_v27 = vld [vmem:[#allocation8 + $0x1a0] sm:$0xff]  ;;  %v922_v29 = vld [vmem:[#allocation8 + $0x1b0] sm:$0xff]  ;;  %v943_v40 = vld [vmem:[#allocation10 + $0x58] sm:$0xff] }
 0x157   :  { %v630_v47 = vsel %vm2089_vm5, 0.0, %v620_v45  ;;  %v645_v48 = vsel %vm2073_vm4, 0.0, %v636_v46  ;;  %1054 = vmatpush.msrb.mxu0 %v920_v27  ;;  %1094 = vmatpush.msrb.mxu1 %v922_v29  ;;  %v910_v43 = vld [vmem:[#allocation8 + $0x150] sm:$0xff]  ;;  %v904_v45 = vld [vmem:[#allocation8 + $0x120] sm:$0xff]  ;;  %v905_v46 = vld [vmem:[#allocation8 + $0x128] sm:$0xff] }
 0x158   :  { %v606_v49 = vadd.f32 %v1678_v9, %v599_v44  ;;  %1649 = vmatmul.msk.f32.gmra.mxu3 %vm665_vm9, %v630_v47  ;;  %1652 = vmatmul.msk.f32.gmra.mxu0 %vm665_vm9, %v645_v48  ;;  %v941_v9 = vld [vmem:[#allocation10 + $0x48] sm:$0xff]  ;;  %v939_v44 = vld [vmem:[#allocation10 + $0x38] sm:$0xff]  ;;  %v906_v47 = vld [vmem:[#allocation8 + $0x130] sm:$0xff] }
 0x159   :  { %1000 = vmatpush.msra.mxu3 %v941_v9  ;;  %1055 = vmatpush.msrb.mxu0 %v916_v31  ;;  %v880_v9 = vld [vmem:[#allocation8 + $0x60] sm:$0xff]  ;;  %v1931_v31 = vmov 16.0  }
 0x15a   :  { %v610_v50 = vmax.f32 %v606_v49, 0.0  ;;  %1095 = vmatpush.msrb.mxu1 %v918_v33  ;;  %v935_v49 = vld [vmem:[#allocation10 + $0x18] sm:$0xff]  ;;  %1683 = vrcp.f32 %v1931_v31  ;;  %v1200_v31 = vld [vmem:[#allocation11 + $0x190] sm:$0xff] }
 0x15b   :  { %1001 = vmatpush.msra.mxu3 %v937_v12  ;;  %1056 = vmatpush.msrb.mxu0 %v912_v7 }
 0x15c   :  { %1646 = vmatmul.msk.f32.gmra.mxu2 %vm665_vm9, %v610_v50  ;;  %v621_v51 = vrot.slane %v610_v50, 7  ;;  %v637_v52 = vrot.slane %v610_v50, 1  ;;  %1096 = vmatpush.msrb.mxu1 %v914_v37 }
 0x15d   :  { %1002 = vmatpush.msra.mxu3 %v933_v15 }
 0x15e   :  { %v622_v53 = vsel %vm235_vm3, %v619_v41, %v621_v51  ;;  %v638_v54 = vsel %vm260_vm0, %v635_v42, %v637_v52  ;;  %v643_v34 = vsel %vm260_vm0, %v637_v52, %v610_v50  ;;  %v908_v41 = vld [vmem:[#allocation8 + $0x140] sm:$0xff]  ;;  %v909_v42 = vld [vmem:[#allocation8 + $0x148] sm:$0xff]  ;;  %1097 = vmatpush.msrb.mxu1 %v910_v43 }
 0x15f   :  { %v647_v55 = vsel %vm2100_vm6, 0.0, %v643_v34  ;;  %1072 = vmatpush.msrb.mxu3 %v929_v19  ;;  %1057 = vmatpush.msrb.mxu0 %v908_v41  ;;  %v900_v51 = vld [vmem:[#allocation8 + $0x100] sm:$0xff]  ;;  %v901_v52 = vld [vmem:[#allocation8 + $0x108] sm:$0xff]  ;;  %v898_v34 = vld [vmem:[#allocation8 + $0xf0] sm:$0xff] }
 0x160   :  { %1650 = vmatmul.msk.f32.gmra.mxu3 %vm665_vm9, %v622_v53  ;;  %1653 = vmatmul.msk.f32.gmra.mxu0 %vm665_vm9, %v638_v54  ;;  %v902_v53 = vld [vmem:[#allocation8 + $0x110] sm:$0xff]  ;;  %v896_v54 = vld [vmem:[#allocation8 + $0xe0] sm:$0xff]  ;;  %v873_v19 = vld [vmem:[#allocation8 + $0x28] sm:$0xff] }
 0x161   :  { %1073 = vmatpush.msrb.mxu3 %v925_v24  ;;  %1058 = vmatpush.msrb.mxu0 %v904_v45  ;;  %v868_v24 = vld [vmem:[#allocation8] sm:$0xff] }
 0x162   :  { %1098 = vmatpush.msrb.mxu1 %v906_v47 }
 0x163   :  { %1074 = vmatpush.msrb.mxu3 %v921_v28  ;;  %1059 = vmatpush.msrb.mxu0 %v900_v51 }
 0x164   :  { %1656 = vmatmul.msk.f32.vlgmr.msra.gmra.mxu2 %vm839_vm10, %v832_v23  ;;  %1099 = vmatpush.msrb.mxu1 %v902_v53  ;;  %v897_v23 = vld [vmem:[#allocation8 + $0xe8] sm:$0xff] }
 0x165   :  { %1035 = vmatpush.msra.mxu2 %v963_v17  ;;  %1075 = vmatpush.msrb.mxu3 %v917_v32  ;;  %v878_v17 = vld [vmem:[#allocation8 + $0x50] sm:$0xff] }
 0x166   :  { %1060 = vmatpush.msrb.mxu0 %v896_v54  ;;  %1100 = vmatpush.msrb.mxu1 %v898_v34  ;;  %v1180_v34 = vld [vmem:[#allocation11 + $0xf0] sm:$0xff] }
 0x167   :  { %1036 = vmatpush.msra.mxu2 %v959_v21  ;;  %1076 = vmatpush.msrb.mxu3 %v913_v36  ;;  %v2182_v36 = vpop.eup %1683 }
 0x168   :  { %1654 = vmatmul.msk.f32.gmra.mxu0 %vm665_vm9, %v647_v55  ;;  %1101 = vmatpush.msrb.mxu1 %v894_v59  ;;  %v824_v45 = vmul.f32 16.0, %v2182_v36  ;;  %vm828_vm11 = vweird.f32 %v2182_v36 }
 0x169   :  { %1037 = vmatpush.msra.mxu2 %v955_v26  ;;  %1077 = vmatpush.msrb.mxu3 %v909_v42  ;;  %v870_v26 = vld [vmem:[#allocation8 + $0x10] sm:$0xff] }
 0x16a   :  { %1061 = vmatpush.msrb.mxu0 %v892_v57  ;;  %1102 = vmatpush.msrb.mxu1 %v890_v63  ;;  %v825_v53 = vsub.f32 1.0, %v824_v45  ;;  %v1242_v57 = vld [vmem:[#allocation11 + $0x2e0] sm:$0xff]  ;;  %v1176_v63 = vld [vmem:[#allocation11 + $0xd0] sm:$0xff]  ;;  %v887_v45 = vld [vmem:[#allocation8 + $0x98] sm:$0xff] }
 0x16b   :  { %1038 = vmatpush.msra.mxu2 %v951_v30  ;;  %1078 = vmatpush.msrb.mxu3 %v905_v46 }
 0x16c   :  { %1062 = vmatpush.msrb.mxu0 %v888_v61  ;;  %1103 = vmatpush.msrb.mxu1 %v886_v5  ;;  %v1212_v61 = vld [vmem:[#allocation11 + $0x1f0] sm:$0xff]  ;;  %v1174_v5 = vld [vmem:[#allocation11 + $0xc0] sm:$0xff] }
 0x16d   :  { %1039 = vmatpush.msra.mxu2 %v947_v35  ;;  %1079 = vmatpush.msrb.mxu3 %v901_v52  ;;  %v931_v52 = vld [vmem:[#allocation8 + $0x1f8] sm:$0xff] }
 0x16e   :  { %1063 = vmatpush.msrb.mxu0 %v884_v3  ;;  %1104 = vmatpush.msrb.mxu1 %v882_v11  ;;  %v919_v3 = vld [vmem:[#allocation8 + $0x198] sm:$0xff] }
 0x16f   :  { %1040 = vmatpush.msra.mxu2 %v943_v40  ;;  %1080 = vmatpush.msrb.mxu3 %v897_v23  ;;  %v927_v23 = vld [vmem:[#allocation8 + $0x1d8] sm:$0xff] }
 0x170   :  { %1064 = vmatpush.msrb.mxu0 %v880_v9  ;;  %1105 = vmatpush.msrb.mxu1 %v878_v17  ;;  %v915_v9 = vld [vmem:[#allocation8 + $0x178] sm:$0xff]  ;;  %v1170_v17 = vld [vmem:[#allocation11 + $0xa0] sm:$0xff] }
 0x171   :  { %1041 = vmatpush.msra.mxu2 %v939_v44  ;;  %1081 = vmatpush.msrb.mxu3 %v893_v58 }
 0x172   :  { %1065 = vmatpush.msrb.mxu0 %v876_v13  ;;  %1106 = vmatpush.msrb.mxu1 %v874_v20  ;;  %v1206_v13 = vld [vmem:[#allocation11 + $0x1c0] sm:$0xff]  ;;  %v907_v20 = vld [vmem:[#allocation8 + $0x138] sm:$0xff] }
 0x173   :  { %1042 = vmatpush.msra.mxu2 %v935_v49  ;;  %1082 = vmatpush.msrb.mxu3 %v889_v62  ;;  %v826_v62 = vmul.f32 %v2182_v36, %v825_v53  ;;  %v879_v53 = vld [vmem:[#allocation8 + $0x58] sm:$0xff] }
 0x174   :  { %1066 = vmatpush.msrb.mxu0 %v872_v18  ;;  %1107 = vmatpush.msrb.mxu1 %v870_v26  ;;  %v1204_v18 = vld [vmem:[#allocation11 + $0x1b0] sm:$0xff]  ;;  %v1202_v26 = vld [vmem:[#allocation11 + $0x1a0] sm:$0xff] }
 0x175   :  { %1083 = vmatpush.msrb.mxu3 %v885_v4  ;;  %v1208_v4 = vld [vmem:[#allocation11 + $0x1d0] sm:$0xff]  ;;  %v827_v11 = vadd.f32 %v2182_v36, %v826_v62 }
 0x176   :  { %1067 = vmatpush.msrb.mxu0 %v868_v24  ;;  %v1216_v62 = vld [vmem:[#allocation11 + $0x210] sm:$0xff] }
 0x177   :  { %1084 = vmatpush.msrb.mxu3 %v881_v10  ;;  %v1238_v10 = vld [vmem:[#allocation11 + $0x2c0] sm:$0xff]  ;;  %v829_v24 = vsel %vm828_vm11, %v2182_v36, %v827_v11  ;;  %v895_v36 = vld [vmem:[#allocation8 + $0xd8] sm:$0xff]  ;;  %v1264_v11 = vld [vmem:[#allocation11 + $0x390] sm:$0xff] }
 0x178   :  { %1284 = vmatpush.msra.mxu0 %v1180_v34  ;;  %v1190_v34 = vld [vmem:[#allocation11 + $0x140] sm:$0xff] }
 0x179   :  { %1085 = vmatpush.msrb.mxu3 %v877_v14 }
 0x17b   :  { %1086 = vmatpush.msrb.mxu3 %v873_v19 }
 0x17d   :  { %1087 = vmatpush.msrb.mxu3 %v869_v25  ;;  %v1168_v25 = vld [vmem:[#allocation11 + $0x90] sm:$0xff] }
 0x1c6   :  { %v691_v38 = vpop.f32.mrf.mxu2 }
 0x1ca   :  { %v732_v48 = vpop.f32.mrf.mxu3 }
 0x1cb   :  { %v733_v56 = vadd.f32 %v732_v48, %v691_v38  ;;  %v1680_v38 = vld [vmem:[%s2223_s11 + $0x3] ss:$0 sm:$0xff] }
 0x1cc   :  { %v782_v50 = vpop.f32.mrf.mxu0 }
 0x1cd   :  { %v794_v2 = vadd.f32 %v782_v50, %v733_v56  ;;  %v1178_v56 = vld [vmem:[#allocation11 + $0xe0] sm:$0xff] }
 0x1ce   :  { %1285 = vmatpush.msra.mxu0 %v1178_v56  ;;  %v1220_v56 = vld [vmem:[#allocation11 + $0x230] sm:$0xff] }
 0x1cf   :  { %v694_v55 = vpop.f32.mrf.mxu2  ;;  %v801_v15 = vadd.f32 %v1679_v0, %v794_v2 }
 0x1d0   :  { %1286 = vmatpush.msra.mxu0 %v1176_v63  ;;  %v1274_v63 = vld [vmem:[#allocation11 + $0x3e0] sm:$0xff] }
 0x1d1   :  { %v805_v27 = vmax.f32 %v801_v15, 0.0  ;;  %v911_v15 = vld [vmem:[#allocation8 + $0x158] sm:$0xff] }
 0x1d2   :  { %v735_v60 = vpop.f32.mrf.mxu3  ;;  %1287 = vmatpush.msra.mxu0 %v1174_v5  ;;  %v1214_v5 = vld [vmem:[#allocation11 + $0x200] sm:$0xff] }
 0x1d3   :  { %v736_v39 = vadd.f32 %v735_v60, %v694_v55  ;;  %v1244_v55 = vld [vmem:[#allocation11 + $0x2f0] sm:$0xff]  ;;  %v923_v60 = vld [vmem:[#allocation8 + $0x1b8] sm:$0xff] }
 0x1d5   :  { %v785_v6 = vpop.f32.mrf.mxu0 }
 0x1d6   :  { %v795_v8 = vadd.f32 %v785_v6, %v736_v39  ;;  %v1210_v39 = vld [vmem:[#allocation11 + $0x1e0] sm:$0xff] }
 0x1d7   :  { %v697_v12 = vpop.f32.mrf.mxu2 }
 0x1d8   :  { %v802_v16 = vadd.f32 %v1679_v0, %v795_v8 }
 0x1da   :  { %v806_v21 = vmax.f32 %v802_v16, 0.0  ;;  %v1236_v16 = vld [vmem:[#allocation11 + $0x2b0] sm:$0xff] }
 0x1db   :  { %v738_v22 = vpop.f32.mrf.mxu3 }
 0x1dc   :  { %v809_v29 = vadd.f32 %v806_v21, %v805_v27  ;;  %v739_v30 = vadd.f32 %v738_v22, %v697_v12  ;;  %v1172_v12 = vld [vmem:[#allocation11 + $0xb0] sm:$0xff]  ;;  %v1234_v22 = vld [vmem:[#allocation11 + $0x2a0] sm:$0xff]  ;;  %v903_v27 = vld [vmem:[#allocation8 + $0x118] sm:$0xff] }
 0x1dd   :  { %v788_v28 = vpop.f32.mrf.mxu0  ;;  %1288 = vmatpush.msra.mxu0 %v1172_v12  ;;  %v1179_v12 = vld [vmem:[#allocation11 + $0xe8] sm:$0xff] }
 0x1de   :  { %v810_v33 = vrot.slane %v809_v29, 4  ;;  %v796_v35 = vadd.f32 %v788_v28, %v739_v30  ;;  %v1166_v30 = vld [vmem:[#allocation11 + $0x80] sm:$0xff] }
 0x1df   :  { %v700_v32 = vpop.f32.mrf.mxu2  ;;  %1289 = vmatpush.msra.mxu0 %v1170_v17  ;;  %v1241_v17 = vld [vmem:[#allocation11 + $0x2d8] sm:$0xff] }
 0x1e0   :  { %v811_v41 = vadd.f32 %v810_v33, %v809_v29  ;;  %v803_v42 = vadd.f32 %v1679_v0, %v796_v35  ;;  %v1232_v29 = vld [vmem:[#allocation11 + $0x290] sm:$0xff] }
 0x1e1   :  { %1290 = vmatpush.msra.mxu0 %v1168_v25  ;;  %v1173_v25 = vld [vmem:[#allocation11 + $0xb8] sm:$0xff] }
 0x1e2   :  { %v812_v48 = vrot.slane %v811_v41, 2  ;;  %v807_v49 = vmax.f32 %v803_v42, 0.0  ;;  %v1228_v42 = vld [vmem:[#allocation11 + $0x270] sm:$0xff] }
 0x1e3   :  { %v741_v7 = vpop.f32.mrf.mxu3  ;;  %1291 = vmatpush.msra.mxu0 %v1166_v30  ;;  %v1209_v30 = vld [vmem:[#allocation11 + $0x1d8] sm:$0xff] }
 0x1e4   :  { %v742_v37 = vadd.f32 %v741_v7, %v700_v32  ;;  %v813_v58 = vadd.f32 %v812_v48, %v811_v41  ;;  %v899_v32 = vld [vmem:[#allocation8 + $0xf8] sm:$0xff]  ;;  %v1194_v48 = vld [vmem:[#allocation11 + $0x160] sm:$0xff] }
 0x1e5   :  { %v791_v40 = vpop.f32.mrf.mxu0  ;;  %v891_v41 = vld [vmem:[#allocation8 + $0xb8] sm:$0xff] }
 0x1e6   :  { %v797_v43 = vadd.f32 %v791_v40, %v742_v37  ;;  %v814_v6 = vrot.slane %v813_v58, 1  ;;  %v1230_v37 = vld [vmem:[#allocation11 + $0x280] sm:$0xff] }
 0x1e7   :  { %v864_v44 = vpop.f32.mrf.mxu2  ;;  %v1198_v40 = vld [vmem:[#allocation11 + $0x180] sm:$0xff] }
 0x1e8   :  { %v804_v46 = vadd.f32 %v1679_v0, %v797_v43  ;;  %v865_v47 = vadd.f32 %v1680_v38, %v864_v44  ;;  %v1240_v0 = vld [vmem:[#allocation11 + $0x2d0] sm:$0xff]  ;;  %v815_v21 = vadd.f32 %v814_v6, %v813_v58  ;;  %v1162_v43 = vld [vmem:[#allocation11 + $0x60] sm:$0xff]  ;;  %v871_v58 = vld [vmem:[#allocation8 + $0x18] sm:$0xff] }
 0x1e9   :  { %v1164_v38 = vld [vmem:[#allocation11 + $0x70] sm:$0xff]  ;;  %v1266_v6 = vld [vmem:[#allocation11 + $0x3a0] sm:$0xff] }
 0x1ea   :  { %v808_v50 = vmax.f32 %v804_v46, 0.0  ;;  %v867_v51 = vmax.f32 %v865_v47, 0.0  ;;  %v830_v33 = vmul.f32 %v829_v24, %v815_v21  ;;  %v1196_v44 = vld [vmem:[#allocation11 + $0x170] sm:$0xff]  ;;  %1292 = vmatpush.msra.mxu0 %v1164_v38  ;;  %v1226_v46 = vld [vmem:[#allocation11 + $0x260] sm:$0xff]  ;;  %v1213_v21 = vld [vmem:[#allocation11 + $0x1f8] sm:$0xff] }
 0x1eb   :  { %v1160_v47 = vld [vmem:[#allocation11 + $0x50] sm:$0xff]  ;;  %v1205_v38 = vld [vmem:[#allocation11 + $0x1b8] sm:$0xff] }
 0x1ec   :  { %v816_v54 = vadd.f32 %v808_v50, %v807_v49  ;;  %1657 = vmatmul.msk.f32.vlgmr.msrb.gmra.mxu2 %vm665_vm9, %v867_v51  ;;  %1658 = vmatmul.msk.f32.vlgmr.msra.gmra.mxu3 %vm665_vm9, %v867_v51  ;;  %v883_v49 = vld [vmem:[#allocation8 + $0x78] sm:$0xff]  ;;  %v1224_v50 = vld [vmem:[#allocation11 + $0x250] sm:$0xff] }
 0x1ed   :  { %1659 = vmatmul.msk.f32.vlgmr.msra.gmra.mxu1 %vm665_vm9, %v867_v51  ;;  %1112 = vmatpush.msrb.mxu2 %v931_v52  ;;  %v1192_v52 = vld [vmem:[#allocation11 + $0x150] sm:$0xff] }
 0x1ee   :  { %v817_v59 = vrot.slane %v816_v54, 4  ;;  %1324 = vmatpush.msra.mxu1 %v1244_v55  ;;  %1304 = vmatpush.msra.mxu3 %v1212_v61  ;;  %v875_v55 = vld [vmem:[#allocation8 + $0x38] sm:$0xff]  ;;  %v1276_v61 = vld [vmem:[#allocation11 + $0x3f0] sm:$0xff] }
 0x1ef   :  { %1113 = vmatpush.msrb.mxu2 %v927_v23  ;;  %1293 = vmatpush.msra.mxu0 %v1162_v43  ;;  %v1156_v23 = vld [vmem:[#allocation11 + $0x30] sm:$0xff]  ;;  %v1203_v43 = vld [vmem:[#allocation11 + $0x1a8] sm:$0xff] }
 0x1f0   :  { %v818_v2 = vadd.f32 %v817_v59, %v816_v54  ;;  %1325 = vmatpush.msra.mxu1 %v1242_v57  ;;  %1305 = vmatpush.msra.mxu3 %v1210_v39  ;;  %v1222_v54 = vld [vmem:[#allocation11 + $0x240] sm:$0xff] }
 0x1f1   :  { %1114 = vmatpush.msrb.mxu2 %v923_v60  ;;  %1294 = vmatpush.msra.mxu0 %v1160_v47  ;;  %v1154_v57 = vld [vmem:[#allocation11 + $0x20] sm:$0xff]  ;;  %v1152_v60 = vld [vmem:[#allocation11 + $0x10] sm:$0xff]  ;;  %v1201_v47 = vld [vmem:[#allocation11 + $0x198] sm:$0xff] }
 0x1f2   :  { %v819_v8 = vrot.slane %v818_v2, 2  ;;  %1326 = vmatpush.msra.mxu1 %v1240_v0  ;;  %1306 = vmatpush.msra.mxu3 %v1208_v4  ;;  %v1218_v59 = vld [vmem:[#allocation11 + $0x220] sm:$0xff]  ;;  %v1272_v0 = vld [vmem:[#allocation11 + $0x3d0] sm:$0xff] }
 0x1f3   :  { %1115 = vmatpush.msrb.mxu2 %v919_v3  ;;  %v1270_v39 = vld [vmem:[#allocation11 + $0x3c0] sm:$0xff]  ;;  %v1188_v4 = vld [vmem:[#allocation11 + $0x130] sm:$0xff] }
 0x1f4   :  { %v820_v14 = vadd.f32 %v819_v8, %v818_v2  ;;  %1660 = vmatmul.msk.f32.vlgmr.msra.gmra.mxu2 %vm665_vm9, %v867_v51  ;;  %1327 = vmatpush.msra.mxu1 %v1238_v10  ;;  %v1158_v51 = vld [vmem:[#allocation11 + $0x40] sm:$0xff]  ;;  %v1268_v2 = vld [vmem:[#allocation11 + $0x3b0] sm:$0xff]  ;;  %v1181_v8 = vld [vmem:[#allocation11 + $0xf8] sm:$0xff] }
 0x1f5   :  { %1116 = vmatpush.msrb.mxu2 %v915_v9  ;;  %1307 = vmatpush.msra.mxu3 %v1206_v13  ;;  %v1150_v3 = vld [vmem:[#allocation11] sm:$0xff]  ;;  %v1245_v9 = vld [vmem:[#allocation11 + $0x2f8] sm:$0xff]  ;;  %v1243_v13 = vld [vmem:[#allocation11 + $0x2e8] sm:$0xff] }
 0x1f6   :  { %v821_v19 = vrot.slane %v820_v14, 1  ;;  %1328 = vmatpush.msra.mxu1 %v1236_v16  ;;  %1295 = vmatpush.msra.mxu0 %v1158_v51  ;;  %v1186_v10 = vld [vmem:[#allocation11 + $0x120] sm:$0xff]  ;;  %v1177_v16 = vld [vmem:[#allocation11 + $0xd8] sm:$0xff]  ;;  %v1199_v51 = vld [vmem:[#allocation11 + $0x188] sm:$0xff] }
 0x1f7   :  { %1117 = vmatpush.msrb.mxu2 %v911_v15  ;;  %1308 = vmatpush.msra.mxu3 %v1204_v18  ;;  %v1262_v15 = vld [vmem:[#allocation11 + $0x380] sm:$0xff] }
 0x1f8   :  { %v822_v28 = vadd.f32 %v821_v19, %v820_v14  ;;  %1329 = vmatpush.msra.mxu1 %v1234_v22  ;;  %1296 = vmatpush.msra.mxu0 %v1156_v23  ;;  %v1184_v14 = vld [vmem:[#allocation11 + $0x110] sm:$0xff]  ;;  %v1182_v18 = vld [vmem:[#allocation11 + $0x100] sm:$0xff]  ;;  %v1239_v22 = vld [vmem:[#allocation11 + $0x2c8] sm:$0xff] }
 0x1f9   :  { %1118 = vmatpush.msrb.mxu2 %v907_v20  ;;  %1309 = vmatpush.msra.mxu3 %v1202_v26  ;;  %v1260_v19 = vld [vmem:[#allocation11 + $0x370] sm:$0xff]  ;;  %v1175_v20 = vld [vmem:[#allocation11 + $0xc8] sm:$0xff]  ;;  %v1197_v23 = vld [vmem:[#allocation11 + $0x178] sm:$0xff] }
 0x1fa   :  { %v831_v35 = vmul.f32 %v829_v24, %v822_v28  ;;  %1330 = vmatpush.msra.mxu1 %v1232_v29  ;;  %1297 = vmatpush.msra.mxu0 %v1154_v57  ;;  %v1258_v24 = vld [vmem:[#allocation11 + $0x360] sm:$0xff]  ;;  %v1211_v26 = vld [vmem:[#allocation11 + $0x1e8] sm:$0xff]  ;;  %v1256_v28 = vld [vmem:[#allocation11 + $0x350] sm:$0xff] }
 0x1fb   :  { %1119 = vmatpush.msrb.mxu2 %v903_v27  ;;  %1310 = vmatpush.msra.mxu3 %v1200_v31  ;;  %v1237_v27 = vld [vmem:[#allocation11 + $0x2b8] sm:$0xff]  ;;  %v1171_v29 = vld [vmem:[#allocation11 + $0xa8] sm:$0xff] }
 0x1fc   :  { %v1050_v7 = vsel %vm1049_vm12, %v831_v35, %v830_v33  ;;  %1331 = vmatpush.msra.mxu1 %v1230_v37  ;;  %1298 = vmatpush.msra.mxu0 %v1152_v60  ;;  %v1235_v31 = vld [vmem:[#allocation11 + $0x2a8] sm:$0xff]  ;;  %v1169_v33 = vld [vmem:[#allocation11 + $0x98] sm:$0xff] }
 0x1fd   :  { %1120 = vmatpush.msrb.mxu2 %v899_v32  ;;  %1068 = vmatmul.f32.vlgmr.msrb.gmra.mxu0 %v1050_v7  ;;  %v1254_v32 = vld [vmem:[#allocation11 + $0x340] sm:$0xff]  ;;  %v1207_v35 = vld [vmem:[#allocation11 + $0x1c8] sm:$0xff] }
 0x1fe   :  { %1088 = vmatmul.f32.vlgmr.msrb.gmra.mxu3 %v1050_v7  ;;  %1108 = vmatmul.f32.vlgmr.msrb.gmra.mxu1 %v1050_v7  ;;  %v1167_v37 = vld [vmem:[#allocation11 + $0x88] sm:$0xff] }
 0x1ff   :  { %1121 = vmatpush.msrb.mxu2 %v895_v36  ;;  %1311 = vmatpush.msra.mxu3 %v1198_v40  ;;  %v1252_v36 = vld [vmem:[#allocation11 + $0x330] sm:$0xff]  ;;  %v1231_v40 = vld [vmem:[#allocation11 + $0x288] sm:$0xff] }
 0x200   :  { %1332 = vmatpush.msra.mxu1 %v1228_v42  ;;  %1299 = vmatpush.msra.mxu0 %v1150_v3  ;;  %v1165_v42 = vld [vmem:[#allocation11 + $0x78] sm:$0xff]  ;;  %v1195_v57 = vld [vmem:[#allocation11 + $0x168] sm:$0xff] }
 0x201   :  { %1122 = vmatpush.msrb.mxu2 %v891_v41  ;;  %1312 = vmatpush.msra.mxu3 %v1196_v44  ;;  %v1250_v41 = vld [vmem:[#allocation11 + $0x320] sm:$0xff]  ;;  %v1229_v44 = vld [vmem:[#allocation11 + $0x278] sm:$0xff]  ;;  %v1155_v60 = vld [vmem:[#allocation11 + $0x28] sm:$0xff] }
 0x202   :  { %1333 = vmatpush.msra.mxu1 %v1226_v46  ;;  %1364 = vmatpush.msrb.mxu0 %v1181_v8  ;;  %v1163_v46 = vld [vmem:[#allocation11 + $0x68] sm:$0xff]  ;;  %v1269_v3 = vld [vmem:[#allocation11 + $0x3b8] sm:$0xff] }
 0x203   :  { %1123 = vmatpush.msrb.mxu2 %v887_v45  ;;  %1313 = vmatpush.msra.mxu3 %v1194_v48  ;;  %v1248_v45 = vld [vmem:[#allocation11 + $0x310] sm:$0xff]  ;;  %v1227_v48 = vld [vmem:[#allocation11 + $0x268] sm:$0xff] }
 0x204   :  { %1334 = vmatpush.msra.mxu1 %v1224_v50  ;;  %1365 = vmatpush.msrb.mxu0 %v1179_v12  ;;  %v1161_v50 = vld [vmem:[#allocation11 + $0x58] sm:$0xff]  ;;  %v1267_v8 = vld [vmem:[#allocation11 + $0x3a8] sm:$0xff] }
 0x205   :  { %1124 = vmatpush.msrb.mxu2 %v883_v49  ;;  %1314 = vmatpush.msra.mxu3 %v1192_v52  ;;  %v1246_v49 = vld [vmem:[#allocation11 + $0x300] sm:$0xff]  ;;  %v1225_v52 = vld [vmem:[#allocation11 + $0x258] sm:$0xff]  ;;  %v1263_v12 = vld [vmem:[#allocation11 + $0x388] sm:$0xff] }
 0x206   :  { %1335 = vmatpush.msra.mxu1 %v1222_v54  ;;  %1366 = vmatpush.msrb.mxu0 %v1177_v16  ;;  %v1159_v54 = vld [vmem:[#allocation11 + $0x48] sm:$0xff]  ;;  %v1257_v16 = vld [vmem:[#allocation11 + $0x358] sm:$0xff] }
 0x207   :  { %1125 = vmatpush.msrb.mxu2 %v879_v53  ;;  %1315 = vmatpush.msra.mxu3 %v1190_v34  ;;  %v1277_v53 = vld [vmem:[#allocation11 + $0x3f8] sm:$0xff]  ;;  %v1223_v34 = vld [vmem:[#allocation11 + $0x248] sm:$0xff] }
 0x208   :  { %1336 = vmatpush.msra.mxu1 %v1220_v56  ;;  %1367 = vmatpush.msrb.mxu0 %v1175_v20  ;;  %v1157_v56 = vld [vmem:[#allocation11 + $0x38] sm:$0xff] }
 0x209   :  { %1126 = vmatpush.msrb.mxu2 %v875_v55  ;;  %1316 = vmatpush.msra.mxu3 %v1188_v4  ;;  %v1275_v55 = vld [vmem:[#allocation11 + $0x3e8] sm:$0xff]  ;;  %v1253_v20 = vld [vmem:[#allocation11 + $0x338] sm:$0xff] }
 0x20a   :  { %1337 = vmatpush.msra.mxu1 %v1218_v59  ;;  %1368 = vmatpush.msrb.mxu0 %v1173_v25  ;;  %v1273_v59 = vld [vmem:[#allocation11 + $0x3d8] sm:$0xff]  ;;  %v1151_v4 = vld [vmem:[#allocation11 + $0x8] sm:$0xff] }
 0x20b   :  { %1127 = vmatpush.msrb.mxu2 %v871_v58  ;;  %1317 = vmatpush.msra.mxu3 %v1186_v10  ;;  %v1221_v58 = vld [vmem:[#allocation11 + $0x238] sm:$0xff] }
 0x20c   :  { %1128 = vmatmul.f32.vlgmr.msrb.gmra.mxu2 %v1050_v7  ;;  %1338 = vmatpush.msra.mxu1 %v1216_v62  ;;  %v1233_v7 = vld [vmem:[#allocation11 + $0x298] sm:$0xff]  ;;  %v1219_v62 = vld [vmem:[#allocation11 + $0x228] sm:$0xff] }
 0x20d   :  { %1344 = vmatpush.msra.mxu2 %v1276_v61  ;;  %1318 = vmatpush.msra.mxu3 %v1184_v14  ;;  %v1193_v61 = vld [vmem:[#allocation11 + $0x158] sm:$0xff] }
 0x20e   :  { %1339 = vmatpush.msra.mxu1 %v1214_v5  ;;  %1369 = vmatpush.msrb.mxu0 %v1171_v29  ;;  %v1189_v5 = vld [vmem:[#allocation11 + $0x138] sm:$0xff] }
 0x20f   :  { %1345 = vmatpush.msra.mxu2 %v1274_v63  ;;  %1319 = vmatpush.msra.mxu3 %v1182_v18  ;;  %v1271_v63 = vld [vmem:[#allocation11 + $0x3c8] sm:$0xff]  ;;  %v1265_v10 = vld [vmem:[#allocation11 + $0x398] sm:$0xff] }
 0x210   :  { %1404 = vmatpush.msrb.mxu1 %v1245_v9  ;;  %1370 = vmatpush.msrb.mxu0 %v1169_v33  ;;  %v1187_v9 = vld [vmem:[#allocation11 + $0x128] sm:$0xff]  ;;  %v1261_v14 = vld [vmem:[#allocation11 + $0x378] sm:$0xff] }
 0x211   :  { %1346 = vmatpush.msra.mxu2 %v1272_v0  ;;  %1384 = vmatpush.msrb.mxu3 %v1213_v21  ;;  %v1153_v0 = vld [vmem:[#allocation11 + $0x18] sm:$0xff]  ;;  %v1255_v18 = vld [vmem:[#allocation11 + $0x348] sm:$0xff] }
 0x212   :  { %1405 = vmatpush.msrb.mxu1 %v1243_v13  ;;  %1371 = vmatpush.msrb.mxu0 %v1167_v37  ;;  %v1183_v13 = vld [vmem:[#allocation11 + $0x108] sm:$0xff] }
 0x213   :  { %1347 = vmatpush.msra.mxu2 %v1270_v39  ;;  %1385 = vmatpush.msrb.mxu3 %v1211_v26  ;;  %v1191_v39 = vld [vmem:[#allocation11 + $0x148] sm:$0xff] }
 0x214   :  { %1406 = vmatpush.msrb.mxu1 %v1241_v17  ;;  %1372 = vmatpush.msrb.mxu0 %v1165_v42  ;;  %v1251_v21 = vld [vmem:[#allocation11 + $0x328] sm:$0xff] }
 0x215   :  { %1348 = vmatpush.msra.mxu2 %v1268_v2  ;;  %1386 = vmatpush.msrb.mxu3 %v1209_v30  ;;  %v1217_v2 = vld [vmem:[#allocation11 + $0x218] sm:$0xff] }
 0x216   :  { %1407 = vmatpush.msrb.mxu1 %v1239_v22  ;;  %1373 = vmatpush.msrb.mxu0 %v1163_v46 }
 0x217   :  { %1349 = vmatpush.msra.mxu2 %v1266_v6  ;;  %1387 = vmatpush.msrb.mxu3 %v1207_v35  ;;  %v1215_v6 = vld [vmem:[#allocation11 + $0x208] sm:$0xff] }
 0x218   :  { %1408 = vmatpush.msrb.mxu1 %v1237_v27  ;;  %1374 = vmatpush.msrb.mxu0 %v1161_v50  ;;  %v1460_v50 = vld [vmem:[#allocation13 + $0x70] sm:$0xff] }
 0x219   :  { %1350 = vmatpush.msra.mxu2 %v1264_v11  ;;  %1388 = vmatpush.msrb.mxu3 %v1205_v38  ;;  %v1185_v11 = vld [vmem:[#allocation11 + $0x118] sm:$0xff] }
 0x21a   :  { %1409 = vmatpush.msrb.mxu1 %v1235_v31  ;;  %1375 = vmatpush.msrb.mxu0 %v1159_v54  ;;  %v1477_v54 = vld [vmem:[#allocation13 + $0xf8] sm:$0xff] }
 0x21b   :  { %1351 = vmatpush.msra.mxu2 %v1262_v15  ;;  %1389 = vmatpush.msrb.mxu3 %v1203_v43  ;;  %v1259_v15 = vld [vmem:[#allocation11 + $0x368] sm:$0xff] }
 0x21c   :  { %1410 = vmatpush.msrb.mxu1 %v1233_v7  ;;  %1376 = vmatpush.msrb.mxu0 %v1157_v56  ;;  %v1475_v56 = vld [vmem:[#allocation13 + $0xe8] sm:$0xff] }
 0x21d   :  { %1352 = vmatpush.msra.mxu2 %v1260_v19  ;;  %1390 = vmatpush.msrb.mxu3 %v1201_v47  ;;  %v1132_v19 = vld [vmem:[%s2223_s11 + $0x4] sm:$0xf] }
 0x21e   :  { %1411 = vmatpush.msrb.mxu1 %v1231_v40  ;;  %1377 = vmatpush.msrb.mxu0 %v1155_v60  ;;  %v1136_v27 = vperm.slane %v1132_v19, 2  ;;  %v1135_v37 = vperm.slane %v1132_v19, 1  ;;  %v1473_v60 = vld [vmem:[#allocation13 + $0xd8] sm:$0xff] }
 0x21f   :  { %1353 = vmatpush.msra.mxu2 %v1258_v24  ;;  %1391 = vmatpush.msrb.mxu3 %v1199_v51  ;;  %v1134_v24 = vperm.slane %v1132_v19, 0  ;;  %v1459_v51 = vld [vmem:[#allocation13 + $0x68] sm:$0xff] }
 0x220   :  { %1412 = vmatpush.msrb.mxu1 %v1229_v44  ;;  %1378 = vmatpush.msrb.mxu0 %v1153_v0  ;;  %v1137_v44 = vperm.slane %v1132_v19, 3  ;;  %v1471_v0 = vld [vmem:[#allocation13 + $0xc8] sm:$0xff]  ;;  %v1535_v19 = vld [vmem:[#allocation14 + $0x60] sm:$0xff] }
 0x221   :  { %1354 = vmatpush.msra.mxu2 %v1256_v28  ;;  %1392 = vmatpush.msrb.mxu3 %v1197_v23  ;;  %v1249_v28 = vld [vmem:[#allocation11 + $0x318] sm:$0xff]  ;;  %v1456_v23 = vld [vmem:[#allocation13 + $0x50] sm:$0xff] }
 0x222   :  { %1413 = vmatpush.msrb.mxu1 %v1227_v48  ;;  %1379 = vmatpush.msrb.mxu0 %v1151_v4  ;;  %v1469_v4 = vld [vmem:[#allocation13 + $0xb8] sm:$0xff] }
 0x223   :  { %1355 = vmatpush.msra.mxu2 %v1254_v32  ;;  %1393 = vmatpush.msrb.mxu3 %v1195_v57  ;;  %v1247_v32 = vld [vmem:[#allocation11 + $0x308] sm:$0xff]  ;;  %v1454_v57 = vld [vmem:[#allocation13 + $0x40] sm:$0xff] }
 0x224   :  { %1414 = vmatpush.msrb.mxu1 %v1225_v52  ;;  %v1458_v52 = vld [vmem:[#allocation13 + $0x60] sm:$0xff] }
 0x225   :  { %1356 = vmatpush.msra.mxu2 %v1252_v36  ;;  %1394 = vmatpush.msrb.mxu3 %v1193_v61  ;;  %v1452_v61 = vld [vmem:[#allocation13 + $0x30] sm:$0xff] }
 0x226   :  { %1415 = vmatpush.msrb.mxu1 %v1223_v34  ;;  %v1476_v34 = vld [vmem:[#allocation13 + $0xf0] sm:$0xff] }
 0x227   :  { %1357 = vmatpush.msra.mxu2 %v1250_v41  ;;  %1395 = vmatpush.msrb.mxu3 %v1191_v39  ;;  %v1450_v39 = vld [vmem:[#allocation13 + $0x20] sm:$0xff] }
 0x228   :  { %1416 = vmatpush.msrb.mxu1 %v1221_v58  ;;  %v1474_v58 = vld [vmem:[#allocation13 + $0xe0] sm:$0xff] }
 0x229   :  { %1358 = vmatpush.msra.mxu2 %v1248_v45  ;;  %1396 = vmatpush.msrb.mxu3 %v1189_v5  ;;  %v1448_v5 = vld [vmem:[#allocation13 + $0x10] sm:$0xff] }
 0x22a   :  { %1417 = vmatpush.msrb.mxu1 %v1219_v62  ;;  %v1472_v62 = vld [vmem:[#allocation13 + $0xd0] sm:$0xff] }
 0x22b   :  { %1359 = vmatpush.msra.mxu2 %v1246_v49  ;;  %1397 = vmatpush.msrb.mxu3 %v1187_v9  ;;  %v1461_v49 = vld [vmem:[#allocation13 + $0x78] sm:$0xff]  ;;  %v1467_v9 = vld [vmem:[#allocation13 + $0xa8] sm:$0xff] }
 0x22c   :  { %1418 = vmatpush.msrb.mxu1 %v1217_v2  ;;  %v1470_v2 = vld [vmem:[#allocation13 + $0xc0] sm:$0xff] }
 0x22d   :  { %1424 = vmatpush.msrb.mxu2 %v1277_v53  ;;  %1398 = vmatpush.msrb.mxu3 %v1185_v11  ;;  %v1457_v53 = vld [vmem:[#allocation13 + $0x58] sm:$0xff]  ;;  %v1466_v11 = vld [vmem:[#allocation13 + $0xa0] sm:$0xff] }
 0x22e   :  { %1419 = vmatpush.msrb.mxu1 %v1215_v6  ;;  %v1468_v6 = vld [vmem:[#allocation13 + $0xb0] sm:$0xff] }
 0x22f   :  { %1425 = vmatpush.msrb.mxu2 %v1275_v55  ;;  %1399 = vmatpush.msrb.mxu3 %v1183_v13  ;;  %v1455_v55 = vld [vmem:[#allocation13 + $0x48] sm:$0xff]  ;;  %v1464_v13 = vld [vmem:[#allocation13 + $0x90] sm:$0xff] }
 0x231   :  { %1426 = vmatpush.msrb.mxu2 %v1273_v59  ;;  %v1453_v59 = vld [vmem:[#allocation13 + $0x38] sm:$0xff] }
 0x233   :  { %1427 = vmatpush.msrb.mxu2 %v1271_v63  ;;  %v1451_v63 = vld [vmem:[#allocation13 + $0x28] sm:$0xff] }
 0x235   :  { %1428 = vmatpush.msrb.mxu2 %v1269_v3  ;;  %v1449_v3 = vld [vmem:[#allocation13 + $0x18] sm:$0xff] }
 0x237   :  { %1429 = vmatpush.msrb.mxu2 %v1267_v8  ;;  %v1447_v8 = vld [vmem:[#allocation13 + $0x8] sm:$0xff] }
 0x239   :  { %1430 = vmatpush.msrb.mxu2 %v1265_v10  ;;  %v1446_v10 = vld [vmem:[#allocation13] sm:$0xff] }
 0x23b   :  { %1431 = vmatpush.msrb.mxu2 %v1263_v12  ;;  %v1465_v12 = vld [vmem:[#allocation13 + $0x98] sm:$0xff] }
 0x23d   :  { %1432 = vmatpush.msrb.mxu2 %v1261_v14  ;;  %v1463_v14 = vld [vmem:[#allocation13 + $0x88] sm:$0xff] }
 0x23f   :  { %1433 = vmatpush.msrb.mxu2 %v1259_v15  ;;  %v1462_v15 = vld [vmem:[#allocation13 + $0x80] sm:$0xff] }
 0x241   :  { %1434 = vmatpush.msrb.mxu2 %v1257_v16  ;;  %v1538_v16 = vld [vmem:[#allocation14 + $0x78] sm:$0xff] }
 0x243   :  { %1435 = vmatpush.msrb.mxu2 %v1255_v18  ;;  %v1536_v18 = vld [vmem:[#allocation14 + $0x68] sm:$0xff] }
 0x245   :  { %1436 = vmatpush.msrb.mxu2 %v1253_v20  ;;  %v1278_v20 = vld [vmem:[%s2223_s11 + $0x8] sm:$0x3] }
 0x247   :  { %1437 = vmatpush.msrb.mxu2 %v1251_v21  ;;  %v1534_v21 = vld [vmem:[#allocation14 + $0x58] sm:$0xff] }
 0x249   :  { %1438 = vmatpush.msrb.mxu2 %v1249_v28 }
 0x24b   :  { %1439 = vmatpush.msrb.mxu2 %v1247_v32 }
 0x26a   :  { %v1024_v17 = vpop.f32.mrf.mxu1 }
 0x26f   :  { %v1004_v22 = vpop.f32.mrf.mxu3  ;;  %v984_v25 = vpop.f32.mrf.mxu2 }
 0x277   :  { %v1044_v43 = vpop.f32.mrf.mxu2 }
 0x27a   :  { %v1069_v26 = vpop.f32.mrf.mxu0 }
 0x27b   :  { %v1070_v29 = vadd.f32 %v1069_v26, %v984_v25  ;;  %v1109_v30 = vpop.f32.mrf.mxu1  ;;  %v1533_v25 = vld [vmem:[#allocation14 + $0x50] sm:$0xff] }
 0x27c   :  { %v1110_v31 = vadd.f32 %v1109_v30, %v1024_v17  ;;  %v1537_v17 = vld [vmem:[#allocation14 + $0x70] sm:$0xff]  ;;  %v1281_v30 = vperm.slane %v1278_v20, 1 }
 0x27d   :  { %v1142_v33 = vadd.f32 %v1134_v24, %v1070_v29  ;;  %v1280_v24 = vperm.slane %v1278_v20, 0 }
 0x27e   :  { %v1144_v35 = vadd.f32 %v1136_v27, %v1110_v31 }
 0x27f   :  { %v1146_v7 = vmax.f32 %v1142_v33, 0.0 }
 0x280   :  { %v1148_v36 = vmax.f32 %v1144_v35, 0.0 }
 0x281   :  { %v1089_v38 = vpop.f32.mrf.mxu3  ;;  %1300 = vmatmul.f32.vlgmr.msra.gmra.mxu0 %v1146_v7 }
 0x282   :  { %v1090_v40 = vadd.f32 %v1089_v38, %v1004_v22  ;;  %1340 = vmatmul.f32.vlgmr.msra.gmra.mxu1 %v1148_v36  ;;  %1482 = vmatpush.msra.mxu0 %v1461_v49  ;;  %v1528_v49 = vld [vmem:[#allocation14 + $0x28] sm:$0xff] }
 0x283   :  { %1543 = vmatpush.msra.mxu1 %v1538_v16 }
 0x284   :  { %v1143_v41 = vadd.f32 %v1135_v37, %v1090_v40  ;;  %1483 = vmatpush.msra.mxu0 %v1460_v50  ;;  %v1527_v50 = vld [vmem:[#allocation14 + $0x20] sm:$0xff] }
 0x285   :  { %1544 = vmatpush.msra.mxu1 %v1537_v17 }
 0x286   :  { %v1147_v42 = vmax.f32 %v1143_v41, 0.0  ;;  %1484 = vmatpush.msra.mxu0 %v1459_v51  ;;  %v1526_v51 = vld [vmem:[#allocation14 + $0x18] sm:$0xff] }
 0x287   :  { %1545 = vmatpush.msra.mxu1 %v1536_v18 }
 0x288   :  { %1320 = vmatmul.f32.vlgmr.msra.gmra.mxu3 %v1147_v42  ;;  %1485 = vmatpush.msra.mxu0 %v1458_v52  ;;  %v1525_v52 = vld [vmem:[#allocation14 + $0x10] sm:$0xff] }
 0x289   :  { %1380 = vmatmul.f32.vlgmr.msrb.gmra.mxu0 %v1146_v7  ;;  %1502 = vmatpush.msra.mxu3 %v1477_v54  ;;  %v1523_v54 = vld [vmem:[#allocation14] sm:$0xff] }
 0x28a   :  { %1420 = vmatmul.f32.vlgmr.msrb.gmra.mxu1 %v1148_v36  ;;  %1486 = vmatpush.msra.mxu0 %v1457_v53  ;;  %v1524_v53 = vld [vmem:[#allocation14 + $0x8] sm:$0xff] }
 0x28b   :  { %1503 = vmatpush.msra.mxu3 %v1476_v34  ;;  %1546 = vmatpush.msra.mxu1 %v1535_v19 }
 0x28c   :  { %1487 = vmatpush.msra.mxu0 %v1456_v23  ;;  %v1681_v23 = vld [vmem:[%s2223_s11 + $0xa] ss:$0 sm:$0xff] }
 0x28d   :  { %1504 = vmatpush.msra.mxu3 %v1475_v56  ;;  %1547 = vmatpush.msra.mxu1 %v1534_v21 }
 0x28e   :  { %1488 = vmatpush.msra.mxu0 %v1455_v55 }
 0x28f   :  { %v1129_v45 = vpop.f32.mrf.mxu2  ;;  %1505 = vmatpush.msra.mxu3 %v1474_v58  ;;  %1548 = vmatpush.msra.mxu1 %v1533_v25 }
 0x290   :  { %v1130_v46 = vadd.f32 %v1129_v45, %v1044_v43  ;;  %1400 = vmatmul.f32.vlgmr.msrb.gmra.mxu3 %v1147_v42  ;;  %1489 = vmatpush.msra.mxu0 %v1454_v57  ;;  %v1532_v45 = vld [vmem:[#allocation14 + $0x48] sm:$0xff] }
 0x291   :  { %1506 = vmatpush.msra.mxu3 %v1473_v60  ;;  %1549 = vmatpush.msra.mxu1 %v1532_v45 }
 0x292   :  { %v1145_v47 = vadd.f32 %v1137_v44, %v1130_v46  ;;  %1490 = vmatpush.msra.mxu0 %v1453_v59  ;;  %v1531_v46 = vld [vmem:[#allocation14 + $0x40] sm:$0xff]  ;;  %v1682_v59 = vld [vmem:[%s2223_s11 + $0xb] ss:$0 sm:$0xff]  ;;  %s1932_s11 = smov [#allocation16]  }
 0x293   :  { %1507 = vmatpush.msra.mxu3 %v1472_v62  ;;  %1550 = vmatpush.msra.mxu1 %v1531_v46  ;;  %s1601_s26 = sshll.u32 %s1932_s11, 4  ;;  %s1602_s26 = int_to_ptr.vmem [resolvable:$true] %s1601_s26 }
 0x294   :  { %v1149_v48 = vmax.f32 %v1145_v47, 0.0  ;;  %1491 = vmatpush.msra.mxu0 %v1452_v61  ;;  %v1530_v47 = vld [vmem:[#allocation14 + $0x38] sm:$0xff] }
 0x295   :  { %1508 = vmatpush.msra.mxu3 %v1471_v0  ;;  %1551 = vmatpush.msra.mxu1 %v1530_v47 }
 0x296   :  { %1360 = vmatmul.f32.vlgmr.msra.gmra.mxu2 %v1149_v48  ;;  %1492 = vmatpush.msra.mxu0 %v1451_v63 }
 0x297   :  { %1509 = vmatpush.msra.mxu3 %v1470_v2 }
 0x298   :  { %1493 = vmatpush.msra.mxu0 %v1450_v39 }
 0x299   :  { %1510 = vmatpush.msra.mxu3 %v1469_v4 }
 0x29a   :  { %1494 = vmatpush.msra.mxu0 %v1449_v3 }
 0x29b   :  { %1511 = vmatpush.msra.mxu3 %v1468_v6 }
 0x29c   :  { %1495 = vmatpush.msra.mxu0 %v1448_v5 }
 0x29d   :  { %1512 = vmatpush.msra.mxu3 %v1467_v9 }
 0x29e   :  { %1440 = vmatmul.f32.vlgmr.msrb.gmra.mxu2 %v1149_v48  ;;  %1496 = vmatpush.msra.mxu0 %v1447_v8  ;;  %v1529_v48 = vld [vmem:[#allocation14 + $0x30] sm:$0xff] }
 0x29f   :  { %1513 = vmatpush.msra.mxu3 %v1466_v11  ;;  %1552 = vmatpush.msra.mxu1 %v1529_v48 }
 0x2a0   :  { %1497 = vmatpush.msra.mxu0 %v1446_v10 }
 0x2a1   :  { %1514 = vmatpush.msra.mxu3 %v1465_v12  ;;  %1553 = vmatpush.msra.mxu1 %v1528_v49 }
 0x2a3   :  { %1515 = vmatpush.msra.mxu3 %v1464_v13  ;;  %1554 = vmatpush.msra.mxu1 %v1527_v50 }
 0x2a5   :  { %1516 = vmatpush.msra.mxu3 %v1463_v14  ;;  %1555 = vmatpush.msra.mxu1 %v1526_v51 }
 0x2a7   :  { %1517 = vmatpush.msra.mxu3 %v1462_v15  ;;  %1556 = vmatpush.msra.mxu1 %v1525_v52 }
 0x2a9   :  { %1557 = vmatpush.msra.mxu1 %v1524_v53 }
 0x2ab   :  { %1558 = vmatpush.msra.mxu1 %v1523_v54 }
 0x2fe   :  { %v1301_v22 = vpop.f32.mrf.mxu0 }
 0x2ff   :  { %v1302_v27 = vadd.f32 %v1301_v22, %v1280_v24  ;;  %v1341_v29 = vpop.f32.mrf.mxu1 }
 0x306   :  { %v1381_v31 = vpop.f32.mrf.mxu0 }
 0x307   :  { %v1382_v7 = vadd.f32 %v1381_v31, %v1281_v30  ;;  %v1421_v40 = vpop.f32.mrf.mxu1 }
 0x30b   :  { %v1321_v26 = vpop.f32.mrf.mxu3 }
 0x30c   :  { %v1322_v28 = vadd.f32 %v1321_v26, %v1302_v27 }
 0x30e   :  { %v1342_v32 = vadd.f32 %v1341_v29, %v1322_v28 }
 0x313   :  { %v1401_v33 = vpop.f32.mrf.mxu3 }
 0x314   :  { %v1402_v37 = vadd.f32 %v1401_v33, %v1382_v7 }
 0x316   :  { %v1422_v41 = vadd.f32 %v1421_v40, %v1402_v37 }
 0x319   :  { %v1361_v35 = vpop.f32.mrf.mxu2 }
 0x31a   :  { %v1362_v36 = vadd.f32 %v1361_v35, %v1342_v32 }
 0x31c   :  { %v1444_v38 = vmax.f32 %v1362_v36, 0.0 }
 0x31e   :  { %1498 = vmatmul.f32.vlgmr.msra.gmra.mxu0 %v1444_v38 }
 0x321   :  { %v1441_v42 = vpop.f32.mrf.mxu2 }
 0x322   :  { %v1442_v43 = vadd.f32 %v1441_v42, %v1422_v41 }
 0x324   :  { %v1445_v44 = vmax.f32 %v1442_v43, 0.0 }
 0x326   :  { %1518 = vmatmul.f32.vlgmr.msra.gmra.mxu3 %v1445_v44 }
 0x39b   :  { %v1499_v34 = vpop.f32.mrf.mxu0 }
 0x39c   :  { %v1500_v55 = vadd.f32 %v1681_v23, %v1499_v34 }
 0x3a9   :  { %v1519_v56 = vpop.f32.mrf.mxu3 }
 0x3aa   :  { %v1520_v57 = vadd.f32 %v1519_v56, %v1500_v55 }
 0x3ac   :  { %v1522_v58 = vmax.f32 %v1520_v57, 0.0 }
 0x3ae   :  { %1559 = vmatmul.f32.vlgmr.msra.gmra.mxu1 %v1522_v58 }
 0x42b   :  { %v1560_v60 = vpop.f32.mrf.mxu1 }
 0x42c   :  { %v1561_v61 = vadd.f32 %v1682_v59, %v1560_v60 }
 0x42e   :  { %v1569_v62 = vsel %vm1566_vm13, %v1561_v61, 0.0 }
 0x42f   :  { %v1571_v63 = vsel %vm1570_vm14, %v1569_v62, -inf }
 0x430   :  { %1572 = vmax.xlane.f32.xlu0 %v1571_v63 }
 0x4a3   :  { %v1573_v0 = vpop.xlane.xlu0 %1572 }
 0x4a4   :  { %v1574_v39 = vsub.f32 %v1569_v62, %v1573_v0 }
 0x4a6   :  { %v1575_v2 = vmul.f32 1.442695, %v1574_v39 }
 0x4a8   :  { %1685 = vpow2.f32 %v1575_v2 }
 0x4ae   :  { %v1686_v3 = vpop.eup %1685 }
 0x4af   :  { %v1577_v4 = vsel %vm1570_vm14, %v1686_v3, 0.0 }
 0x4b0   :  { %1578 = vadd.xlane.f32.xlu0 %v1577_v4 }
 0x523   :  { %v1579_v5 = vpop.xlane.xlu0 %1578 }
 0x524   :  { %1687 = vrcp.f32 %v1579_v5  ;;  %v1591_v10 = vand.u32 2147483648, %v1579_v5  ;;  %v1589_v1 = vand.u32 2147483647, %v1579_v5  ;;  %vm1585_vm0 = vweird.f32 %v1579_v5 }
 0x526   :  { %v1592_v13 = vor.u32 1.1754944e-38, %v1591_v10  ;;  %vm1590_vm2 = vcmp.eq.f32.partialorder %v1589_v1, 8.507059e+37 }
 0x52a   :  { %v1688_v6 = vpop.eup %1687 }
 0x52b   :  { %v1581_v8 = vmul.f32 %v1688_v6, %v1579_v5  ;;  %vm1586_vm15 = vweird.f32 %v1688_v6 }
 0x52c   :  { %vm1587_vm1 = vmor %vm1585_vm0, %vm1586_vm15 }
 0x52d   :  { %v1582_v9 = vsub.f32 1.0, %v1581_v8 }
 0x52f   :  { %v1583_v11 = vmul.f32 %v1688_v6, %v1582_v9 }
 0x531   :  { %v1584_v12 = vadd.f32 %v1688_v6, %v1583_v11 }
 0x533   :  { %v1588_v14 = vsel %vm1587_vm1, %v1688_v6, %v1584_v12 }
 0x534   :  { %v1593_v15 = vsel %vm1590_vm2, %v1592_v13, %v1588_v14 }
 0x535   :  { %v1594_v16 = vmul.f32 %v1686_v3, %v1593_v15 }
 0x537   :  { %1595 = vst [vmem:[#allocation16] sm:$0x3] %v1594_v16 }
 0x538   :  { %1606 = dma.vmem_to_hbm [thread:$0]  %s1602_s26, 32, %s1604_s13, [#allocation4]  }
 0x539   :  { %1915 = dma.done.wait [#allocation4], 32  }
 0x53a   :  { %1916 = vsyncadd [#allocation4], 4294967264 }
 0x53b   :  { %1611 = vsyncpa [#allocation3], 1 }
 0x53c   :  { %1612 = vsyncpa [#allocation6], 1 }
 0x53d   :  { %1613 = vsyncpa [#allocation9], 1 }
 0x53e   :  { %1614 = vsyncpa [#allocation12], 1 }
 0x53f   :  { %1615 = vsyncpa [#allocation15], 1 }
 0x540   :  { %1616 = vsyncpa [#allocation4], 1 }

</bundles_post_ra>
